<compile_context>
chip_gen: v7x
topology: tpu7x:2x2x1
jax: 0.10.0
libtpu: 0.0.40
codegen_flags: <defaults>
</compile_context>

<pallas_src>
import functools

import jax
import jax.numpy as jnp
from jax.experimental import pallas as pl
from jax.experimental.pallas import tpu as pltpu


# ---------------------------------------------------------------------------
# Fused Pallas kernel: QKV proj -> batched per-head attention -> out proj
# ---------------------------------------------------------------------------
def _fused_sep_attn_kernel(*refs, L, S, E, H, block_b, has_mask, need_weights,
                           mxu_dtype):
    x_ref, w_in_ref, b_in_ref, w_out_ref, b_out_ref = refs[:5]
    pos = 5
    mask_ref = None
    if has_mask:
        mask_ref = refs[pos]
        pos += 1
    o_ref = refs[pos]
    pos += 1
    wgt_ref = refs[pos] if need_weights else None

    dh = E // H
    inv_h = 1.0 / H

    # Hoisted parameter loads (shared by every batch element in the block).
    w_in = w_in_ref[...].astype(mxu_dtype)     # [E, 3E] (q cols pre-scaled)
    b_in = b_in_ref[...]                       # [1, 3E] (f32)
    w_out = w_out_ref[...].astype(mxu_dtype)   # [E, E]
    b_out = b_out_ref[...]                     # [1, E]  (f32)
    mask = mask_ref[...] if has_mask else None  # [L, S] f32

    # ---- batched QKV projection: one matmul, M = block_b*L ----------------
    x = x_ref[...].astype(mxu_dtype)                              # [bB*L, E]
    qkv = jnp.dot(x, w_in, preferred_element_type=jnp.float32) + b_in  # [bB*L, 3E]

    ctx_parts = []
    p_sum = jnp.zeros((block_b, L, S), jnp.float32) if need_weights else None

    for h in range(H):
        # head slices (3*H per block, not per element) + batch-major reshape
        q_h = qkv[:, h * dh:(h + 1) * dh].reshape(block_b, L, dh)
        k_h = qkv[:, E + h * dh:E + (h + 1) * dh].reshape(block_b, S, dh)
        v_h = qkv[:, 2 * E + h * dh:2 * E + (h + 1) * dh].reshape(block_b, S, dh)

        # scores, batched over the block (no explicit transpose)
        s = jnp.einsum('bld,bsd->bls', q_h.astype(mxu_dtype),
                       k_h.astype(mxu_dtype),
                       preferred_element_type=jnp.float32)        # [bB, L, S]
        if has_mask:
            s = s + mask[None, :, :]

        # row softmax (f32 stats; fully -inf-masked rows yield NaN like torch)
        m = jnp.max(s, axis=-1, keepdims=True)
        p = jnp.exp(s - m)
        l = jnp.sum(p, axis=-1, keepdims=True)
        if mxu_dtype == jnp.bfloat16:
            inv = pl.reciprocal(l, approx=True)   # EUP slot, within bf16 tol
        else:
            inv = 1.0 / l                         # exact, keeps 1e-4 parity
        p = p * inv

        if need_weights:
            p_sum = p_sum + p

        ctx_h = jnp.einsum('bls,bsd->bld', p.astype(mxu_dtype),
                           v_h.astype(mxu_dtype),
                           preferred_element_type=jnp.float32)    # [bB, L, dh]
        ctx_parts.append(ctx_h.reshape(block_b * L, dh))

    # head merge + output projection fused into ONE K=E matmul for the block
    ctx = jnp.concatenate(ctx_parts, axis=-1)                     # [bB*L, E]
    out = jnp.dot(ctx.astype(mxu_dtype), w_out,
                  preferred_element_type=jnp.float32) + b_out     # [bB*L, E]
    o_ref[...] = out.astype(o_ref.dtype)

    if need_weights:
        wgt_ref[...] = (p_sum * inv_h).astype(wgt_ref.dtype)


# ---------------------------------------------------------------------------
# block_b picker: largest divisor of bsz that fits the VMEM budget, preferring
# n_blk >= 2 so the "parallel" grid axis engages both TCs on v7x.
# ---------------------------------------------------------------------------
def _pick_block_b(bsz, L, S, E, need_weights, budget_bytes=28 << 20):
    def footprint(b):
        io = 2 * (b * L * E * 4) * 2                 # x + o, double-buffered
        if need_weights:
            io += 2 * (b * L * S * 4)                # wgt, double-buffered
        params_ = 2 * (E * 3 * E + E * E + 4 * E + L * S) * 4
        # rough in-kernel working set (qkv, ctx, scores/probs, p_sum, bf16 copies)
        work = b * L * (4 * E + 6 * S) * 4 + b * L * 3 * E * 2
        return io + params_ + work

    divisors = sorted((d for d in range(1, bsz + 1) if bsz % d == 0),
                      reverse=True)
    # block's second-minor dim (block_b*L) must be a multiple of 8 or full
    valid = [d for d in divisors if (d * L) % 8 == 0 or d == bsz]
    if not valid:
        valid = [bsz]
    fits = [d for d in valid if footprint(d) <= budget_bytes]
    if not fits:
        choice = min(valid)
    else:
        multi = [d for d in fits if bsz // d >= 2]
        choice = multi[0] if multi else fits[0]
    vmem_bytes = int(min(48 << 20, max(16 << 20, 2 * footprint(choice))))
    return choice, vmem_bytes


# ---------------------------------------------------------------------------
# Module wrapper (layout plumbing + parameter prep only)
# ---------------------------------------------------------------------------
def separable_attention_forward(query, key, value, params, num_heads,
                                attn_mask=None, tgt_attn=True,
                                need_weights=True, mxu_dtype=jnp.float32):
    if not (query is key and key is value):
        # TODO(synk): separate k/v (cross-attention) projection path not implemented.
        raise NotImplementedError("only the qkv-same (self-attention) path is fused")

    if not tgt_attn:
        query = jnp.swapaxes(query, 0, 1)

    out_len, src_size, true_bsz, e = query.shape
    in_len = out_len                          # qkv-same  =>  S == L
    head_dim = e // num_heads
    scaling = head_dim ** (-0.5)
    bsz = src_size * true_bsz

    w_in = params["in_proj_weight"]           # [3E, E]
    b_in = params["in_proj_bias"]             # [3E]
    w_out = params["out_proj_weight"]         # [E, E]
    b_out = params["out_proj_bias"]           # [E]

    # fold the q scaling into Wq / bq (constant-folded outside the hot path)
    scale_vec = jnp.concatenate([
        jnp.full((e,), scaling, dtype=w_in.dtype),
        jnp.ones((2 * e,), dtype=w_in.dtype)])
    w_in_t = w_in.T * scale_vec[None, :]              # [E, 3E]
    b_in_s = (b_in * scale_vec).reshape(1, 3 * e)     # [1, 3E]
    w_out_t = w_out.T                                 # [E, E]
    b_out_2d = b_out.reshape(1, e)                    # [1, E]

    # [L, src, B, E] -> [bsz, L, E] (batch-major) -> [bsz*L, E]
    # so each grid block is a contiguous [block_b*L, E] slab (M = block_b*L).
    x2d = jnp.transpose(query, (1, 2, 0, 3)).reshape(bsz * out_len, e)

    block_b, vmem_bytes = _pick_block_b(bsz, out_len, in_len, e, need_weights)
    n_blk = bsz // block_b

    has_mask = attn_mask is not None
    inputs = [x2d, w_in_t, b_in_s, w_out_t, b_out_2d]
    in_specs = [
        pl.BlockSpec((block_b * out_len, e), lambda g: (g, 0)),
        pl.BlockSpec((e, 3 * e), lambda g: (0, 0)),
        pl.BlockSpec((1, 3 * e), lambda g: (0, 0)),
        pl.BlockSpec((e, e), lambda g: (0, 0)),
        pl.BlockSpec((1, e), lambda g: (0, 0)),
    ]
    if has_mask:
        inputs.append(attn_mask.astype(jnp.float32))
        in_specs.append(pl.BlockSpec((out_len, in_len), lambda g: (0, 0)))

    o_struct = jax.ShapeDtypeStruct((bsz * out_len, e), query.dtype)
    o_spec = pl.BlockSpec((block_b * out_len, e), lambda g: (g, 0))
    if need_weights:
        out_shape = (o_struct,
                     jax.ShapeDtypeStruct((bsz, out_len, in_len), jnp.float32))
        out_specs = (o_spec,
                     pl.BlockSpec((block_b, out_len, in_len), lambda g: (g, 0, 0)))
    else:
        out_shape = o_struct
        out_specs = o_spec

    kernel = functools.partial(
        _fused_sep_attn_kernel, L=out_len, S=in_len, E=e, H=num_heads,
        block_b=block_b, has_mask=has_mask, need_weights=need_weights,
        mxu_dtype=mxu_dtype)

    result = pl.pallas_call(
        kernel,
        out_shape=out_shape,
        grid=(n_blk,),
        in_specs=in_specs,
        out_specs=out_specs,
        compiler_params=pltpu.CompilerParams(
            dimension_semantics=("parallel",),
            vmem_limit_bytes=vmem_bytes),
    )(*inputs)

    if need_weights:
        attn2d, wgt = result
    else:
        attn2d, wgt = result, None

    # [bsz*L, E] -> [src, B, L, E] -> [L, src, B, E]
    attn = jnp.transpose(
        attn2d.reshape(src_size, true_bsz, out_len, e), (2, 0, 1, 3))
    if not tgt_attn:
        attn = jnp.swapaxes(attn, 0, 1)

    attn_weights = None
    if need_weights:
        attn_weights = wgt.reshape(src_size, true_bsz, out_len, in_len)
    return attn, attn_weights


# ---------------------------------------------------------------------------
# Pure-JAX reference (mirrors the PyTorch forward, qkv_same path, eval mode)
# ---------------------------------------------------------------------------
def reference_forward(query, params, num_heads, attn_mask):
    out_len, src_size, true_bsz, e = query.shape
    dh = e // num_heads
    bsz = src_size * true_bsz
    bh = bsz * num_heads
    w_in, b_in = params["in_proj_weight"], params["in_proj_bias"]
    w_out, b_out = params["out_proj_weight"], params["out_proj_bias"]

    qkv = query.reshape(-1, e) @ w_in.T + b_in
    q, k, v = jnp.split(qkv, 3, axis=-1)
    q = q * (dh ** -0.5)
    q = q.reshape(out_len, bh, dh).transpose(1, 0, 2)
    k = k.reshape(out_len, bh, dh).transpose(1, 0, 2)
    v = v.reshape(out_len, bh, dh).transpose(1, 0, 2)
    s = jnp.einsum("bld,bsd->bls", q, k) + attn_mask[None]
    p = jax.nn.softmax(s, axis=-1)
    attn = jnp.einsum("bls,bsd->bld", p, v)
    attn = attn.transpose(1, 0, 2).reshape(out_len, src_size, true_bsz, e)
    attn = attn @ w_out.T + b_out
    w = p.reshape(src_size, true_bsz, num_heads, out_len, out_len).sum(axis=2) / num_heads
    return attn, w


# ---------------------------------------------------------------------------
# main
# ---------------------------------------------------------------------------
if __name__ == "__main__":
    out_len, src_size, true_bsz = 8, 4, 2
    embed_dim, num_heads = 32, 4

    key0 = jax.random.PRNGKey(0)
    k1, k2, k3 = jax.random.split(key0, 3)

    # Deterministic xavier-uniform-style init (synthetic, no checkpoint load).
    bound_in = (6.0 / (3 * embed_dim + embed_dim)) ** 0.5
    bound_out = (6.0 / (embed_dim + embed_dim)) ** 0.5
    params = {
        "in_proj_weight": jax.random.uniform(k1, (3 * embed_dim, embed_dim),
                                             jnp.float32, -bound_in, bound_in),
        "in_proj_bias": jnp.zeros((3 * embed_dim,), jnp.float32),
        "out_proj_weight": jax.random.uniform(k2, (embed_dim, embed_dim),
                                              jnp.float32, -bound_out, bound_out),
        "out_proj_bias": jnp.zeros((embed_dim,), jnp.float32),
    }

    # decoder self-attention: query == key == value, causal additive attn_mask
    x = jax.random.normal(k3, (out_len, src_size, true_bsz, embed_dim), jnp.float32)
    causal = jnp.triu(jnp.full((out_len, out_len), -jnp.inf, jnp.float32), k=1)

    ref_attn, ref_w = reference_forward(x, params, num_heads, causal)

    # ---- f32 path (strict parity) -----------------------------------------
    attn, attn_weights = separable_attention_forward(
        x, x, x, params, num_heads, attn_mask=causal, tgt_attn=True)
    attn = jax.block_until_ready(attn)
    attn_weights = jax.block_until_ready(attn_weights)
    assert attn.shape == (out_len, src_size, true_bsz, embed_dim)
    assert attn_weights.shape == (src_size, true_bsz, out_len, out_len)
    assert jnp.allclose(attn, ref_attn, rtol=1e-4, atol=1e-4)
    assert jnp.allclose(attn_weights, ref_w, rtol=1e-4, atol=1e-4)

    # ---- bf16 MXU path (v6e/v7x throughput; looser tolerance) --------------
    attn_bf, w_bf = separable_attention_forward(
        x, x, x, params, num_heads, attn_mask=causal, tgt_attn=True,
        mxu_dtype=jnp.bfloat16)
    attn_bf = jax.block_until_ready(attn_bf)
    w_bf = jax.block_until_ready(w_bf)
    assert jnp.allclose(attn_bf, ref_attn, rtol=3e-2, atol=3e-2)
    assert jnp.allclose(w_bf, ref_w, rtol=3e-2, atol=3e-2)

    # ---- need_weights=False fast path (drops the weights writeback) --------
    attn_nw, none_w = separable_attention_forward(
        x, x, x, params, num_heads, attn_mask=causal, tgt_attn=True,
        need_weights=False)
    attn_nw = jax.block_until_ready(attn_nw)
    assert none_w is None
    assert jnp.allclose(attn_nw, ref_attn, rtol=1e-4, atol=1e-4)

    print("KERNEL_OK")
</pallas_src>

<mosaic_0001>
module attributes {stable_mosaic.version = 11 : i64} {
  func.func @_fused_sep_attn_kernel(%arg0: i32, %arg1: memref<32x32xf32, #tpu.memory_space<vmem>>, %arg2: memref<32x96xf32, #tpu.memory_space<vmem>>, %arg3: memref<1x96xf32, #tpu.memory_space<vmem>>, %arg4: memref<32x32xf32, #tpu.memory_space<vmem>>, %arg5: memref<1x32xf32, #tpu.memory_space<vmem>>, %arg6: memref<8x8xf32, #tpu.memory_space<vmem>>, %arg7: memref<32x32xf32, #tpu.memory_space<vmem>>, %arg8: memref<4x8x8xf32, #tpu.memory_space<vmem>>) attributes {dimension_semantics = [#tpu.dimension_semantics<parallel>], iteration_bounds = array<i64: 2>, scalar_prefetch = 0 : i64, scratch_operands = 0 : i64, tpu.core_type = #tpu.core_type<tc>, window_params = [{transform_indices = @transform_0, window_bounds = array<i64: 32, 32>}, {pipeline_mode = #tpu.pipeline_mode<synchronous>, transform_indices = @transform_1, window_bounds = array<i64: 32, 96>}, {pipeline_mode = #tpu.pipeline_mode<synchronous>, transform_indices = @transform_2, window_bounds = array<i64: 1, 96>}, {pipeline_mode = #tpu.pipeline_mode<synchronous>, transform_indices = @transform_3, window_bounds = array<i64: 32, 32>}, {pipeline_mode = #tpu.pipeline_mode<synchronous>, transform_indices = @transform_4, window_bounds = array<i64: 1, 32>}, {pipeline_mode = #tpu.pipeline_mode<synchronous>, transform_indices = @transform_5, window_bounds = array<i64: 8, 8>}, {transform_indices = @transform_6, window_bounds = array<i64: 32, 32>}, {transform_indices = @transform_7, window_bounds = array<i64: 4, 8, 8>}]} {
    %c0 = arith.constant 0 : index
    %c0_0 = arith.constant 0 : index
    %0 = vector.load %arg2[%c0, %c0_0] : memref<32x96xf32, #tpu.memory_space<vmem>>, vector<32x96xf32>
    %c0_1 = arith.constant 0 : index
    %c0_2 = arith.constant 0 : index
    %1 = vector.load %arg3[%c0_1, %c0_2] : memref<1x96xf32, #tpu.memory_space<vmem>>, vector<1x96xf32>
    %c0_3 = arith.constant 0 : index
    %c0_4 = arith.constant 0 : index
    %2 = vector.load %arg4[%c0_3, %c0_4] : memref<32x32xf32, #tpu.memory_space<vmem>>, vector<32x32xf32>
    %c0_5 = arith.constant 0 : index
    %c0_6 = arith.constant 0 : index
    %3 = vector.load %arg5[%c0_5, %c0_6] : memref<1x32xf32, #tpu.memory_space<vmem>>, vector<1x32xf32>
    %c0_7 = arith.constant 0 : index
    %c0_8 = arith.constant 0 : index
    %4 = vector.load %arg6[%c0_7, %c0_8] : memref<8x8xf32, #tpu.memory_space<vmem>>, vector<8x8xf32>
    %c0_9 = arith.constant 0 : index
    %c0_10 = arith.constant 0 : index
    %5 = vector.load %arg1[%c0_9, %c0_10] : memref<32x32xf32, #tpu.memory_space<vmem>>, vector<32x32xf32>
    %cst = arith.constant dense<0.000000e+00> : vector<32x96xf32>
    %6 = tpu.matmul %5, %0, %cst {dimension_numbers = #tpu.dot_dimension_numbers<[1], [0], [0], [1], [0, 0, 1, 1], [], []>} : vector<32x32xf32>, vector<32x96xf32>, vector<32x96xf32> -> vector<32x96xf32>
    %7 = vector.broadcast %1 : vector<1x96xf32> to vector<32x96xf32>
    %8 = arith.addf %6, %7 : vector<32x96xf32>
    %cst_11 = arith.constant 0.000000e+00 : f32
    %9 = vector.broadcast %cst_11 : f32 to vector<4x8x8xf32>
    %10 = vector.extract_strided_slice %8 {offsets = [0, 0], sizes = [32, 8], strides = [1, 1]} : vector<32x96xf32> to vector<32x8xf32>
    %11 = vector.shape_cast %10 : vector<32x8xf32> to vector<4x8x8xf32>
    %12 = vector.extract_strided_slice %8 {offsets = [0, 32], sizes = [32, 8], strides = [1, 1]} : vector<32x96xf32> to vector<32x8xf32>
    %13 = vector.shape_cast %12 : vector<32x8xf32> to vector<4x8x8xf32>
    %14 = vector.extract_strided_slice %8 {offsets = [0, 64], sizes = [32, 8], strides = [1, 1]} : vector<32x96xf32> to vector<32x8xf32>
    %15 = vector.shape_cast %14 : vector<32x8xf32> to vector<4x8x8xf32>
    "tpu.trace_start"() <{level = 10 : i32, message = "bld,bsd->bls"}> : () -> ()
    %cst_12 = arith.constant dense<0.000000e+00> : vector<4x8x8xf32>
    %16 = tpu.matmul %11, %13, %cst_12 {dimension_numbers = #tpu.dot_dimension_numbers<[2], [2], [1], [1], [0, 0, 0, 1, 1, 1], [0], [0]>} : vector<4x8x8xf32>, vector<4x8x8xf32>, vector<4x8x8xf32> -> vector<4x8x8xf32>
    "tpu.trace_stop"() : () -> ()
    %17 = vector.shape_cast %4 : vector<8x8xf32> to vector<1x8x8xf32>
    %18 = vector.broadcast %17 : vector<1x8x8xf32> to vector<4x8x8xf32>
    %19 = arith.addf %16, %18 : vector<4x8x8xf32>
    %cst_13 = arith.constant dense<0xFF800000> : vector<4x8xf32>
    %20 = vector.multi_reduction <maximumf>, %19, %cst_13 [2] : vector<4x8x8xf32> to vector<4x8xf32>
    %21 = vector.shape_cast %20 : vector<4x8xf32> to vector<4x8x1xf32>
    %22 = vector.broadcast %21 : vector<4x8x1xf32> to vector<4x8x8xf32>
    %23 = arith.subf %19, %22 : vector<4x8x8xf32>
    %24 = math.exp %23 : vector<4x8x8xf32>
    %cst_14 = arith.constant dense<0.000000e+00> : vector<4x8xf32>
    %25 = vector.multi_reduction <add>, %24, %cst_14 [2] : vector<4x8x8xf32> to vector<4x8xf32>
    %26 = vector.shape_cast %25 : vector<4x8xf32> to vector<4x8x1xf32>
    %cst_15 = arith.constant 1.000000e+00 : f32
    %27 = vector.broadcast %cst_15 : f32 to vector<4x8x1xf32>
    %28 = arith.divf %27, %26 : vector<4x8x1xf32>
    %29 = vector.broadcast %28 : vector<4x8x1xf32> to vector<4x8x8xf32>
    %30 = arith.mulf %24, %29 : vector<4x8x8xf32>
    %31 = arith.addf %9, %30 : vector<4x8x8xf32>
    "tpu.trace_start"() <{level = 10 : i32, message = "bls,bsd->bld"}> : () -> ()
    %cst_16 = arith.constant dense<0.000000e+00> : vector<4x8x8xf32>
    %32 = tpu.matmul %30, %15, %cst_16 {dimension_numbers = #tpu.dot_dimension_numbers<[2], [1], [1], [2], [0, 0, 0, 1, 1, 2], [0], [0]>} : vector<4x8x8xf32>, vector<4x8x8xf32>, vector<4x8x8xf32> -> vector<4x8x8xf32>
    "tpu.trace_stop"() : () -> ()
    %33 = vector.shape_cast %32 : vector<4x8x8xf32> to vector<32x8xf32>
    %34 = vector.extract_strided_slice %8 {offsets = [0, 8], sizes = [32, 8], strides = [1, 1]} : vector<32x96xf32> to vector<32x8xf32>
    %35 = vector.shape_cast %34 : vector<32x8xf32> to vector<4x8x8xf32>
    %36 = vector.extract_strided_slice %8 {offsets = [0, 40], sizes = [32, 8], strides = [1, 1]} : vector<32x96xf32> to vector<32x8xf32>
    %37 = vector.shape_cast %36 : vector<32x8xf32> to vector<4x8x8xf32>
    %38 = vector.extract_strided_slice %8 {offsets = [0, 72], sizes = [32, 8], strides = [1, 1]} : vector<32x96xf32> to vector<32x8xf32>
    %39 = vector.shape_cast %38 : vector<32x8xf32> to vector<4x8x8xf32>
    "tpu.trace_start"() <{level = 10 : i32, message = "bld,bsd->bls"}> : () -> ()
    %cst_17 = arith.constant dense<0.000000e+00> : vector<4x8x8xf32>
    %40 = tpu.matmul %35, %37, %cst_17 {dimension_numbers = #tpu.dot_dimension_numbers<[2], [2], [1], [1], [0, 0, 0, 1, 1, 1], [0], [0]>} : vector<4x8x8xf32>, vector<4x8x8xf32>, vector<4x8x8xf32> -> vector<4x8x8xf32>
    "tpu.trace_stop"() : () -> ()
    %41 = vector.shape_cast %4 : vector<8x8xf32> to vector<1x8x8xf32>
    %42 = vector.broadcast %41 : vector<1x8x8xf32> to vector<4x8x8xf32>
    %43 = arith.addf %40, %42 : vector<4x8x8xf32>
    %cst_18 = arith.constant dense<0xFF800000> : vector<4x8xf32>
    %44 = vector.multi_reduction <maximumf>, %43, %cst_18 [2] : vector<4x8x8xf32> to vector<4x8xf32>
    %45 = vector.shape_cast %44 : vector<4x8xf32> to vector<4x8x1xf32>
    %46 = vector.broadcast %45 : vector<4x8x1xf32> to vector<4x8x8xf32>
    %47 = arith.subf %43, %46 : vector<4x8x8xf32>
    %48 = math.exp %47 : vector<4x8x8xf32>
    %cst_19 = arith.constant dense<0.000000e+00> : vector<4x8xf32>
    %49 = vector.multi_reduction <add>, %48, %cst_19 [2] : vector<4x8x8xf32> to vector<4x8xf32>
    %50 = vector.shape_cast %49 : vector<4x8xf32> to vector<4x8x1xf32>
    %cst_20 = arith.constant 1.000000e+00 : f32
    %51 = vector.broadcast %cst_20 : f32 to vector<4x8x1xf32>
    %52 = arith.divf %51, %50 : vector<4x8x1xf32>
    %53 = vector.broadcast %52 : vector<4x8x1xf32> to vector<4x8x8xf32>
    %54 = arith.mulf %48, %53 : vector<4x8x8xf32>
    %55 = arith.addf %31, %54 : vector<4x8x8xf32>
    "tpu.trace_start"() <{level = 10 : i32, message = "bls,bsd->bld"}> : () -> ()
    %cst_21 = arith.constant dense<0.000000e+00> : vector<4x8x8xf32>
    %56 = tpu.matmul %54, %39, %cst_21 {dimension_numbers = #tpu.dot_dimension_numbers<[2], [1], [1], [2], [0, 0, 0, 1, 1, 2], [0], [0]>} : vector<4x8x8xf32>, vector<4x8x8xf32>, vector<4x8x8xf32> -> vector<4x8x8xf32>
    "tpu.trace_stop"() : () -> ()
    %57 = vector.shape_cast %56 : vector<4x8x8xf32> to vector<32x8xf32>
    %58 = vector.extract_strided_slice %8 {offsets = [0, 16], sizes = [32, 8], strides = [1, 1]} : vector<32x96xf32> to vector<32x8xf32>
    %59 = vector.shape_cast %58 : vector<32x8xf32> to vector<4x8x8xf32>
    %60 = vector.extract_strided_slice %8 {offsets = [0, 48], sizes = [32, 8], strides = [1, 1]} : vector<32x96xf32> to vector<32x8xf32>
    %61 = vector.shape_cast %60 : vector<32x8xf32> to vector<4x8x8xf32>
    %62 = vector.extract_strided_slice %8 {offsets = [0, 80], sizes = [32, 8], strides = [1, 1]} : vector<32x96xf32> to vector<32x8xf32>
    %63 = vector.shape_cast %62 : vector<32x8xf32> to vector<4x8x8xf32>
    "tpu.trace_start"() <{level = 10 : i32, message = "bld,bsd->bls"}> : () -> ()
    %cst_22 = arith.constant dense<0.000000e+00> : vector<4x8x8xf32>
    %64 = tpu.matmul %59, %61, %cst_22 {dimension_numbers = #tpu.dot_dimension_numbers<[2], [2], [1], [1], [0, 0, 0, 1, 1, 1], [0], [0]>} : vector<4x8x8xf32>, vector<4x8x8xf32>, vector<4x8x8xf32> -> vector<4x8x8xf32>
    "tpu.trace_stop"() : () -> ()
    %65 = vector.shape_cast %4 : vector<8x8xf32> to vector<1x8x8xf32>
    %66 = vector.broadcast %65 : vector<1x8x8xf32> to vector<4x8x8xf32>
    %67 = arith.addf %64, %66 : vector<4x8x8xf32>
    %cst_23 = arith.constant dense<0xFF800000> : vector<4x8xf32>
    %68 = vector.multi_reduction <maximumf>, %67, %cst_23 [2] : vector<4x8x8xf32> to vector<4x8xf32>
    %69 = vector.shape_cast %68 : vector<4x8xf32> to vector<4x8x1xf32>
    %70 = vector.broadcast %69 : vector<4x8x1xf32> to vector<4x8x8xf32>
    %71 = arith.subf %67, %70 : vector<4x8x8xf32>
    %72 = math.exp %71 : vector<4x8x8xf32>
    %cst_24 = arith.constant dense<0.000000e+00> : vector<4x8xf32>
    %73 = vector.multi_reduction <add>, %72, %cst_24 [2] : vector<4x8x8xf32> to vector<4x8xf32>
    %74 = vector.shape_cast %73 : vector<4x8xf32> to vector<4x8x1xf32>
    %cst_25 = arith.constant 1.000000e+00 : f32
    %75 = vector.broadcast %cst_25 : f32 to vector<4x8x1xf32>
    %76 = arith.divf %75, %74 : vector<4x8x1xf32>
    %77 = vector.broadcast %76 : vector<4x8x1xf32> to vector<4x8x8xf32>
    %78 = arith.mulf %72, %77 : vector<4x8x8xf32>
    %79 = arith.addf %55, %78 : vector<4x8x8xf32>
    "tpu.trace_start"() <{level = 10 : i32, message = "bls,bsd->bld"}> : () -> ()
    %cst_26 = arith.constant dense<0.000000e+00> : vector<4x8x8xf32>
    %80 = tpu.matmul %78, %63, %cst_26 {dimension_numbers = #tpu.dot_dimension_numbers<[2], [1], [1], [2], [0, 0, 0, 1, 1, 2], [0], [0]>} : vector<4x8x8xf32>, vector<4x8x8xf32>, vector<4x8x8xf32> -> vector<4x8x8xf32>
    "tpu.trace_stop"() : () -> ()
    %81 = vector.shape_cast %80 : vector<4x8x8xf32> to vector<32x8xf32>
    %82 = vector.extract_strided_slice %8 {offsets = [0, 24], sizes = [32, 8], strides = [1, 1]} : vector<32x96xf32> to vector<32x8xf32>
    %83 = vector.shape_cast %82 : vector<32x8xf32> to vector<4x8x8xf32>
    %84 = vector.extract_strided_slice %8 {offsets = [0, 56], sizes = [32, 8], strides = [1, 1]} : vector<32x96xf32> to vector<32x8xf32>
    %85 = vector.shape_cast %84 : vector<32x8xf32> to vector<4x8x8xf32>
    %86 = vector.extract_strided_slice %8 {offsets = [0, 88], sizes = [32, 8], strides = [1, 1]} : vector<32x96xf32> to vector<32x8xf32>
    %87 = vector.shape_cast %86 : vector<32x8xf32> to vector<4x8x8xf32>
    "tpu.trace_start"() <{level = 10 : i32, message = "bld,bsd->bls"}> : () -> ()
    %cst_27 = arith.constant dense<0.000000e+00> : vector<4x8x8xf32>
    %88 = tpu.matmul %83, %85, %cst_27 {dimension_numbers = #tpu.dot_dimension_numbers<[2], [2], [1], [1], [0, 0, 0, 1, 1, 1], [0], [0]>} : vector<4x8x8xf32>, vector<4x8x8xf32>, vector<4x8x8xf32> -> vector<4x8x8xf32>
    "tpu.trace_stop"() : () -> ()
    %89 = vector.shape_cast %4 : vector<8x8xf32> to vector<1x8x8xf32>
    %90 = vector.broadcast %89 : vector<1x8x8xf32> to vector<4x8x8xf32>
    %91 = arith.addf %88, %90 : vector<4x8x8xf32>
    %cst_28 = arith.constant dense<0xFF800000> : vector<4x8xf32>
    %92 = vector.multi_reduction <maximumf>, %91, %cst_28 [2] : vector<4x8x8xf32> to vector<4x8xf32>
    %93 = vector.shape_cast %92 : vector<4x8xf32> to vector<4x8x1xf32>
    %94 = vector.broadcast %93 : vector<4x8x1xf32> to vector<4x8x8xf32>
    %95 = arith.subf %91, %94 : vector<4x8x8xf32>
    %96 = math.exp %95 : vector<4x8x8xf32>
    %cst_29 = arith.constant dense<0.000000e+00> : vector<4x8xf32>
    %97 = vector.multi_reduction <add>, %96, %cst_29 [2] : vector<4x8x8xf32> to vector<4x8xf32>
    %98 = vector.shape_cast %97 : vector<4x8xf32> to vector<4x8x1xf32>
    %cst_30 = arith.constant 1.000000e+00 : f32
    %99 = vector.broadcast %cst_30 : f32 to vector<4x8x1xf32>
    %100 = arith.divf %99, %98 : vector<4x8x1xf32>
    %101 = vector.broadcast %100 : vector<4x8x1xf32> to vector<4x8x8xf32>
    %102 = arith.mulf %96, %101 : vector<4x8x8xf32>
    %103 = arith.addf %79, %102 : vector<4x8x8xf32>
    "tpu.trace_start"() <{level = 10 : i32, message = "bls,bsd->bld"}> : () -> ()
    %cst_31 = arith.constant dense<0.000000e+00> : vector<4x8x8xf32>
    %104 = tpu.matmul %102, %87, %cst_31 {dimension_numbers = #tpu.dot_dimension_numbers<[2], [1], [1], [2], [0, 0, 0, 1, 1, 2], [0], [0]>} : vector<4x8x8xf32>, vector<4x8x8xf32>, vector<4x8x8xf32> -> vector<4x8x8xf32>
    "tpu.trace_stop"() : () -> ()
    %105 = vector.shape_cast %104 : vector<4x8x8xf32> to vector<32x8xf32>
    %106 = tpu.concatenate %33, %57, %81, %105 in 1 : vector<32x8xf32>, vector<32x8xf32>, vector<32x8xf32>, vector<32x8xf32> -> vector<32x32xf32>
    %cst_32 = arith.constant dense<0.000000e+00> : vector<32x32xf32>
    %107 = tpu.matmul %106, %2, %cst_32 {dimension_numbers = #tpu.dot_dimension_numbers<[1], [0], [0], [1], [0, 0, 1, 1], [], []>} : vector<32x32xf32>, vector<32x32xf32>, vector<32x32xf32> -> vector<32x32xf32>
    %108 = vector.broadcast %3 : vector<1x32xf32> to vector<32x32xf32>
    %109 = arith.addf %107, %108 : vector<32x32xf32>
    %c0_33 = arith.constant 0 : index
    %c0_34 = arith.constant 0 : index
    %110 = vector.load %arg7[%c0_33, %c0_34] : memref<32x32xf32, #tpu.memory_space<vmem>>, vector<32x32xf32>
    tpu.vector_store %arg7[%c0_33, %c0_34], %109 {strides = array<i32>} : memref<32x32xf32, #tpu.memory_space<vmem>>, vector<32x32xf32>,
    %cst_35 = arith.constant 2.500000e-01 : f32
    %111 = vector.broadcast %cst_35 : f32 to vector<4x8x8xf32>
    %112 = arith.mulf %103, %111 : vector<4x8x8xf32>
    %c0_36 = arith.constant 0 : index
    %c0_37 = arith.constant 0 : index
    %c0_38 = arith.constant 0 : index
    %113 = vector.load %arg8[%c0_36, %c0_37, %c0_38] : memref<4x8x8xf32, #tpu.memory_space<vmem>>, vector<4x8x8xf32>
    tpu.vector_store %arg8[%c0_36, %c0_37, %c0_38], %112 {strides = array<i32>} : memref<4x8x8xf32, #tpu.memory_space<vmem>>, vector<4x8x8xf32>,
    return
  }
  func.func @transform_0(%arg0: i32) -> (i32, i32) {
    %c0_i32 = arith.constant 0 : i32
    %c0_i32_0 = arith.constant 0 : i32
    return %arg0, %c0_i32 : i32, i32
  }
  func.func @transform_1(%arg0: i32) -> (i32, i32) {
    %c0_i32 = arith.constant 0 : i32
    %c0_i32_0 = arith.constant 0 : i32
    %c0_i32_1 = arith.constant 0 : i32
    return %c0_i32, %c0_i32_0 : i32, i32
  }
  func.func @transform_2(%arg0: i32) -> (i32, i32) {
    %c0_i32 = arith.constant 0 : i32
    %c0_i32_0 = arith.constant 0 : i32
    %c0_i32_1 = arith.constant 0 : i32
    return %c0_i32, %c0_i32_0 : i32, i32
  }
  func.func @transform_3(%arg0: i32) -> (i32, i32) {
    %c0_i32 = arith.constant 0 : i32
    %c0_i32_0 = arith.constant 0 : i32
    %c0_i32_1 = arith.constant 0 : i32
    return %c0_i32, %c0_i32_0 : i32, i32
  }
  func.func @transform_4(%arg0: i32) -> (i32, i32) {
    %c0_i32 = arith.constant 0 : i32
    %c0_i32_0 = arith.constant 0 : i32
    %c0_i32_1 = arith.constant 0 : i32
    return %c0_i32, %c0_i32_0 : i32, i32
  }
  func.func @transform_5(%arg0: i32) -> (i32, i32) {
    %c0_i32 = arith.constant 0 : i32
    %c0_i32_0 = arith.constant 0 : i32
    %c0_i32_1 = arith.constant 0 : i32
    return %c0_i32, %c0_i32_0 : i32, i32
  }
  func.func @transform_6(%arg0: i32) -> (i32, i32) {
    %c0_i32 = arith.constant 0 : i32
    %c0_i32_0 = arith.constant 0 : i32
    return %arg0, %c0_i32 : i32, i32
  }
  func.func @transform_7(%arg0: i32) -> (i32, i32, i32) {
    %c0_i32 = arith.constant 0 : i32
    %c0_i32_0 = arith.constant 0 : i32
    %c0_i32_1 = arith.constant 0 : i32
    return %arg0, %c0_i32, %c0_i32_0 : i32, i32, i32
  }
}

</mosaic_0001>

<bundles_post_ra>
// kernel: tpu_custom_call.1
= control target key start
LH: loop header
LB: loop body
LE: loop exit
PB: predicated region body
PF: predicated region fallthrough
CT: control target
= control target key end

     0   :  { %13 = vsyncpa [#allocation3], 0  ;;  %s4501_s0 = inlined_call_operand.vmem [shape: f32[64,32], index: 0, kind: input, shape index: {}]   ;;  %s4502_s1 = inlined_call_operand.vmem [shape: f32[32,96], index: 1, kind: input, shape index: {}]   ;;  %s4503_s2 = inlined_call_operand.vmem [shape: f32[1,96], index: 2, kind: input, shape index: {}]   ;;  %s4504_s3 = inlined_call_operand.vmem [shape: f32[32,32], index: 3, kind: input, shape index: {}]   ;;  %s4505_s4 = inlined_call_operand.vmem [shape: f32[1,32], index: 4, kind: input, shape index: {}]   ;;  %s4506_s5 = inlined_call_operand.vmem [shape: f32[8,8], index: 5, kind: input, shape index: {}]   ;;  %s4507_s6 = inlined_call_operand.vmem [shape: f32[64,32], index: 6, kind: output, shape index: {0}]   ;;  %s4508_s7 = inlined_call_operand.hbm [shape: f32[8,8,8], index: 7, kind: output, shape index: {1}]  }
   0x1   :  { %15 = vsyncpa [#allocation3 + $0x1], 0  ;;  %s3968_s24 = smov 0   ;;  %s3970_s25 = smov 0  }
   0x2   :  { %s3972_s26 = smov 0   ;;  %s3974_s27 = smov 0  }
   0x3 LB: > { %s3989_s28 = sadd.s32 4294967295, %s3908_s27   ;;  %s3369_s29 = sadd.s32 4294967294, %s3908_s27   ;;  %s3908_s27 = sphi %s3974_s27, %s4514_s27   ;;  %s3904_s26 = sphi %s3972_s26, %s4513_s26   ;;  %s3900_s25 = sphi %s3970_s25, %s4512_s25   ;;  %s3896_s24 = sphi %s3968_s24, %s4511_s24  }
   0x4   : > { %s3993_s30 = sadd.s32 1, %s3908_s27   ;;  %s185_s8 = sadd.s32 1, %s3904_s26 }
   0x5   : > { %s182_s9 = ssub.s32 %s3908_s27, %s3993_s30  ;;  %p195_p0 = scmp.ne.s32.totalorder %s3904_s26, %s3900_s25 }
   0x6   : > { %p183_p1 = scmp.eq.s32.totalorder %s182_s9, 0  ;;  %p196_p2 = scmp.eq.s32.totalorder %s3989_s28, 1 }
   0x7   : > { %p201_p3 = scmp.ne.s32.totalorder %s3900_s25, %s3896_s24  ;;  %p202_p4 = scmp.eq.s32.totalorder %s3369_s29, 1 }
   0x8   : > { %s4004_s10 = scalar_select %p183_p1, %s3904_s26, %s185_s8  }
   0x9   : > { %p4006_p5 = por %p196_p2, %p195_p0  ;;  %p4010_p6 = por %p202_p4, %p201_p3 }
   0xa   : > { %p3372_p7 = scmp.ge.s32.totalorder %s3908_s27, 1  ;;  %p244_p8 = scmp.lt.s32.totalorder %s3908_s27, 3 }
   0xc   : > { %p245_p9 = pnand %p3372_p7, %p244_p8 }
   0xd   : > { %v294_v0 = vld [vmem:[%s4502_s1] sm:$0xff] (!%p245_p9)  ;;  %v295_v1 = vld [vmem:[%s4502_s1 + $0x8] sm:$0xff] (!%p245_p9)  ;;  %v296_v2 = vld [vmem:[%s4502_s1 + $0x10] sm:$0xff] (!%p245_p9)  ;;  %s3374_s19 = sshll.u32 (!%p245_p9), %s3989_s28, 2  ;;  %vm315_vm0 = vcmask (!%p245_p9), 261120   ;;  %v3910_v10 = vmov (!%p245_p9), 0.0  }
   0xe   : > { %248 = sbr.rel (%p245_p9) target bundleno = 3195 (0xc7b), region = 44  ;;  %v3710_v3 = vpack.c.bf16 (!%p245_p9), %v295_v1, %v294_v0  ;;  %v297_v4 = vld [vmem:[%s4502_s1 + $0x18] sm:$0xff] (!%p245_p9)  ;;  %p282_p10 = scmp.lt.s32.totalorder (!%p245_p9), %s3374_s19, 7  ;;  %3541 = vmatprep.subr.mxu1 (!%p245_p9), %v3910_v10  ;;  %vm3911_vm1 = vmmov (!%p245_p9), 0   ;;  %v3378_v11 = vld [vmem:[%s4503_s2] ss:$0 sm:$0xff] (!%p245_p9) }
   0xf   : > { %v3714_v5 = vpack.c.bf16 (!%p245_p9), %v297_v4, %v296_v2  ;;  %3543 = vmatprep.mubr.msk.f32.mxu1 (!%p245_p9), %vm3911_vm1, %v3910_v10  ;;  %s3912_s14 = smov (!%p245_p9), 96   ;;  %vm416_vm2 = vcmask (!%p245_p9), 64512   ;;  %v4089_v24 = vld [vmem:[%s4506_s5] sm:$0xff] (!%p245_p9)  ;;  %s3913_s17 = smov (!%p245_p9), 64   ;;  %vm3134_vm3 = vcmask (!%p245_p9), 130048   ;;  %vm3139_vm4 = vcmask (!%p245_p9), 195584  }
  0x10   : > { %3711 = vmatprep.subr.bf16.mxu0 (!%p245_p9), %v3710_v3  ;;  %s3914_s18 = smov (!%p245_p9), 88   ;;  %s3915_s20 = smov (!%p245_p9), 120  }
  0x11   : > { %3713 = vmatpush3.bf16.msra.mxu0 (!%p245_p9), %v3710_v3  ;;  %s3916_s21 = smov (!%p245_p9), 56   ;;  %s3917_s23 = smov (!%p245_p9), 80  }
  0x12   : > { %3715 = vmatprep.subr.bf16.mxu0 (!%p245_p9), %v3714_v5  ;;  %s3918_s29 = smov (!%p245_p9), 112   ;;  %s3920_s9 = smov (!%p245_p9), 72  }
  0x13   : > { %s3921_s13 = smov (!%p245_p9), 104   ;;  %s3923_s15 = smov (!%p245_p9), 8  }
  0x14   : > { %s3924_s16 = smov (!%p245_p9), 16  }
  0x15   : > { %s4516_s19 = smov (!%p282_p10, %s3374_s19), 7  ;;  %3717 = vmatpush3.bf16.msra.mxu0 %v3714_v5 }
  0x16   : > { %s3375_s22 = sshll.u32 %s4516_s19, 3  ;;  %3536 = vmatprep.subr.mxu0 %v3910_v10 }
  0x17   : > { %s285_s8 = scalar_lea.vmem %s4501_s0, %s3375_s22 }
  0x18   : > { %v305_v6 = vld [vmem:[%s285_s8] sm:$0xff]  ;;  %v306_v7 = vld [vmem:[%s285_s8 + $0x8] sm:$0xff]  ;;  %v307_v8 = vld [vmem:[%s285_s8 + $0x10] sm:$0xff] }
  0x19   : > { %3530 = vmatprep.mubr.msk.f32.mxu0 %vm315_vm0, %v305_v6  ;;  %v308_v9 = vld [vmem:[%s285_s8 + $0x18] sm:$0xff]  ;;  %s3919_s8 = smov 48  }
  0x1a   : > { %3531 = vmatmul.mubr.msk.f32.vlgmr.msra.gmra.mrb[0].mxu0 %vm315_vm0, %v306_v7 }
  0x1b   : > { %3533 = vmatprep.mubr.msk.f32.mxu0 %vm315_vm0, %v307_v8 }
  0x1e   : > { %3534 = vmatmul.mubr.msk.f32.gmra.mrb[2].mxu0 %vm315_vm0, %v308_v9 }
  0x1f   : > { %3538 = vmatprep.mubr.msk.f32.mxu0 %vm3911_vm1, %v3910_v10 }
  0xed   : > { %v3532_v12 = vpop.f32.mrb[0].mxu0 }
  0xee   : > { %v394_v13 = vpop.f32.mrb[1].mxu0  ;;  %v4053_v17 = vadd.f32 %v3532_v12, %v3378_v11 }
  0xef   : > { %v4050_v14 = vadd.f32 %v3378_v11, %v394_v13 }
  0xf1   : > { %v3535_v15 = vpop.f32.mrb[2].mxu0  ;;  %414 = vrot.lane.b32.xlu0 %v4050_v14, %s3912_s14 }
  0xf2   : > { %v404_v16 = vpop.f32.mrb[3].mxu0  ;;  %v4057_v19 = vadd.f32 %v3535_v15, %v3378_v11 }
  0xf3   : > { %v4055_v18 = vadd.f32 %v3378_v11, %v404_v16 }
  0xf5   : > { %569 = vrot.lane.b32.xlu1 %v4055_v18, %s3912_s14  ;;  %492 = vrot.lane.b32.xlu0 %v4053_v17, %s3912_s14 }
  0xf9   : > { %646 = vrot.lane.b32.xlu1 %v4057_v19, %s3912_s14  ;;  %s3922_s14 = smov 40  }
 0x163   : > { %v415_v20 = vpop.permute.xlu0 %414 }
 0x164   : > { %3537 = vmatpush3.xpose.msk.msra.mxu0 %vm416_vm2, %v415_v20 }
 0x165   : > { %3551 = vmatprep.subr.mxu0 %v3910_v10 }
 0x167   : > { %v570_v21 = vpop.permute.xlu1 %569  ;;  %3539 = vmatmul.mubr.msk.f32.vlgmr.msra.gmra.mrb[4].mxu0 %vm416_vm2, %v4050_v14  ;;  %v493_v22 = vpop.permute.xlu0 %492 }
 0x168   : > { %3542 = vmatpush3.xpose.msk.msra.mxu1 %vm416_vm2, %v493_v22  ;;  %3553 = vmatprep.mubr.msk.f32.mxu0 %vm3911_vm1, %v3910_v10 }
 0x169   : > { %3546 = vmatprep.subr.mxu1 %v3910_v10 }
 0x16b   : > { %v647_v23 = vpop.permute.xlu1 %646  ;;  %3544 = vmatmul.mubr.msk.f32.vlgmr.msra.gmra.mrb[0].mxu1 %vm416_vm2, %v4053_v17 }
 0x16c   : > { %3547 = vmatpush3.xpose.msk.msra.mxu1 %vm416_vm2, %v570_v21  ;;  %3552 = vmatpush3.xpose.msk.msra.mxu0 %vm416_vm2, %v647_v23 }
 0x16d   : > { %3548 = vmatprep.mubr.msk.f32.mxu1 %vm3911_vm1, %v3910_v10  ;;  %3556 = vmatprep.subr.mxu1 %v3910_v10 }
 0x16e   : > { %3561 = vmatprep.subr.mxu0 %v3910_v10 }
 0x16f   : > { %3549 = vmatmul.mubr.msk.f32.vlgmr.msra.gmra.mrb[2].mxu1 %vm416_vm2, %v4055_v18  ;;  %3554 = vmatmul.mubr.msk.f32.vlgmr.msra.gmra.mrb[6].mxu0 %vm416_vm2, %v4057_v19 }
 0x170   : > { %3558 = vmatprep.mubr.msk.f32.mxu1 %vm3911_vm1, %v3910_v10  ;;  %3563 = vmatprep.mubr.msk.f32.mxu0 %vm3911_vm1, %v3910_v10 }
 0x23a   : > { %v487_v25 = vpop.f32.mrb[4].mxu0 }
 0x23b   : > { %v488_v26 = vadd.f32 %v487_v25, %v4089_v24  ;;  %v3540_v27 = vpop.f32.mrb[5].mxu0 }
 0x23d   : > { %v722_v28 = vsel %vm416_vm2, %v488_v26, -inf }
 0x23e   : > { %723 = vmax.xlane.f32.xlu0 %v722_v28  ;;  %v564_v29 = vpop.f32.mrb[0].mxu1 }
 0x23f   : > { %v565_v30 = vadd.f32 %v564_v29, %v4089_v24  ;;  %v3545_v31 = vpop.f32.mrb[1].mxu1 }
 0x241   : > { %v725_v32 = vsel %vm416_vm2, %v565_v30, -inf }
 0x242   : > { %v718_v33 = vpop.f32.mrb[6].mxu0  ;;  %726 = vmax.xlane.f32.xlu1 %v725_v32  ;;  %v641_v34 = vpop.f32.mrb[2].mxu1 }
 0x243   : > { %v642_v35 = vadd.f32 %v641_v34, %v4089_v24  ;;  %v3550_v36 = vpop.f32.mrb[3].mxu1  ;;  %v3555_v37 = vpop.f32.mrb[7].mxu0  ;;  %v719_v38 = vadd.f32 %v718_v33, %v4089_v24 }
 0x245   : > { %v728_v39 = vsel %vm416_vm2, %v642_v35, -inf  ;;  %v731_v40 = vsel %vm416_vm2, %v719_v38, -inf }
 0x246   : > { %729 = vmax.xlane.f32.xlu0 %v728_v39 }
 0x24a   : > { %732 = vmax.xlane.f32.xlu0 %v731_v40 }
 0x253   : > { %774 = vrot.lane.b32.xlu1 %v4050_v14, %s3913_s17 }
 0x257   : > { %926 = vrot.lane.b32.xlu1 %v4055_v18, %s3913_s17 }
 0x25b   : > { %1002 = vrot.lane.b32.xlu1 %v4057_v19, %s3913_s17 }
 0x25f   : > { %1158 = vrot.lane.b32.xlu1 %v4053_v17, %s3914_s18 }
 0x260   : > { %850 = vrot.lane.b32.xlu0 %v4053_v17, %s3913_s17  ;;  %s278_s17 = sand.u32 1, %s3900_s25  }
 0x264   : > { %1080 = vrot.lane.b32.xlu0 %v4050_v14, %s3914_s18 }
 0x2cb   : > { %v724_v41 = vpop.xlane.xlu0 %723 }
 0x2cc   : > { %v734_v42 = vsub.f32 %v488_v26, %v724_v41 }
 0x2ce   : > { %v738_v43 = vmul.f32 1.442695, %v734_v42 }
 0x2cf   : > { %v727_v44 = vpop.xlane.xlu1 %726 }
 0x2d0   : > { %3782 = vpow2.f32 %v738_v43  ;;  %v735_v45 = vsub.f32 %v565_v30, %v727_v44 }
 0x2d2   : > { %v740_v46 = vmul.f32 1.442695, %v735_v45 }
 0x2d3   : > { %v775_v47 = vpop.permute.xlu1 %774  ;;  %v730_v48 = vpop.xlane.xlu0 %729 }
 0x2d4   : > { %3784 = vpow2.f32 %v740_v46  ;;  %v736_v49 = vsub.f32 %v642_v35, %v730_v48  ;;  %3557 = vmatpush3.msra.mxu1 %v775_v47 }
 0x2d5   : > { %3566 = vmatprep.subr.mxu1 %v3910_v10 }
 0x2d6   : > { %v742_v50 = vmul.f32 1.442695, %v736_v49 }
 0x2d7   : > { %v733_v51 = vpop.xlane.xlu0 %732  ;;  %v927_v63 = vpop.permute.xlu1 %926 }
 0x2d8   : > { %3786 = vpow2.f32 %v742_v50  ;;  %v737_v52 = vsub.f32 %v719_v38, %v733_v51 }
 0x2da   : > { %v3783_v53 = vpop.eup %3782  ;;  %v744_v54 = vmul.f32 1.442695, %v737_v52 }
 0x2db   : > { %v851_v55 = vpop.permute.xlu0 %850  ;;  %v746_v56 = vsel %vm416_vm2, %v3783_v53, 0.0  ;;  %v1003_v0 = vpop.permute.xlu1 %1002 }
 0x2dc   : > { %3788 = vpow2.f32 %v744_v54  ;;  %747 = vadd.xlane.f32.xlu1 %v746_v56  ;;  %3562 = vmatpush3.msra.mxu0 %v851_v55 }
 0x2dd   : > { %3571 = vmatprep.subr.mxu0 %v3910_v10 }
 0x2de   : > { %v3785_v57 = vpop.eup %3784 }
 0x2df   : > { %v749_v58 = vsel %vm416_vm2, %v3785_v57, 0.0  ;;  %v1159_v1 = vpop.permute.xlu1 %1158  ;;  %v1081_v2 = vpop.permute.xlu0 %1080 }
 0x2e0   : > { %750 = vadd.xlane.f32.xlu0 %v749_v58 }
 0x2e2   : > { %v3787_v59 = vpop.eup %3786 }
 0x2e3   : > { %v752_v60 = vsel %vm416_vm2, %v3787_v59, 0.0 }
 0x2e4   : > { %753 = vadd.xlane.f32.xlu1 %v752_v60 }
 0x2e6   : > { %v3789_v61 = vpop.eup %3788 }
 0x2e7   : > { %v755_v62 = vsel %vm416_vm2, %v3789_v61, 0.0 }
 0x2e8   : > { %756 = vadd.xlane.f32.xlu0 %v755_v62 }
 0x2f5   : > { %1156 = vrot.lane.b32.xlu1 %v4053_v17, %s3915_s20 }
 0x2f9   : > { %1314 = vrot.lane.b32.xlu1 %v4057_v19, %s3914_s18 }
 0x2fd   : > { %1312 = vrot.lane.b32.xlu1 %v4057_v19, %s3915_s20 }
 0x2fe   : > { %1078 = vrot.lane.b32.xlu0 %v4050_v14, %s3915_s20 }
 0x302   : > { %1236 = vrot.lane.b32.xlu0 %v4055_v18, %s3914_s18  ;;  %s3373_s18 = sshll.u32 %s278_s17, 5 }
 0x306   : > { %1234 = vrot.lane.b32.xlu0 %v4055_v18, %s3915_s20  ;;  %s4382_s20 = scalar_lea.vmem [#allocation2], %s3373_s18  ;;  %s3925_s18 = smov 24  }
 0x369   : > { %v748_v3 = vpop.xlane.xlu1 %747 }
 0x36a   : > { %3790 = vrcp.f32 %v748_v3 }
 0x36d   : > { %v751_v4 = vpop.xlane.xlu0 %750 }
 0x36e   : > { %3792 = vrcp.f32 %v751_v4 }
 0x371   : > { %v754_v5 = vpop.xlane.xlu1 %753 }
 0x372   : > { %3794 = vrcp.f32 %v754_v5 }
 0x374   : > { %v3791_v6 = vpop.eup %3790 }
 0x375   : > { %v4121_v7 = vmul.f32 %v3791_v6, %v3783_v53  ;;  %v757_v8 = vpop.xlane.xlu0 %756  ;;  %v1157_v16 = vpop.permute.xlu1 %1156 }
 0x376   : > { %3796 = vrcp.f32 %v757_v8 }
 0x377   : > { %3559 = vmatmul.mubr.msk.f32.vlgmr.msra.gmra.mrb[4].mxu1 %vm416_vm2, %v4121_v7 }
 0x378   : > { %v3793_v9 = vpop.eup %3792  ;;  %3567 = vmatpush3.msra.mxu1 %v927_v63  ;;  %3568 = vmatprep.mubr.msk.f32.mxu1 %vm3911_vm1, %v3910_v10 }
 0x379   : > { %v4127_v11 = vmul.f32 %v3793_v9, %v3785_v57  ;;  %3576 = vmatprep.subr.mxu1 %v3910_v10  ;;  %v1079_v12 = vpop.permute.xlu0 %1078  ;;  %v1315_v23 = vpop.permute.xlu1 %1314 }
 0x37b   : > { %3564 = vmatmul.mubr.msk.f32.vlgmr.msra.gmra.mrb[8].mxu0 %vm416_vm2, %v4127_v11 }
 0x37c   : > { %v3795_v13 = vpop.eup %3794  ;;  %3572 = vmatpush3.msra.mxu0 %v1003_v0  ;;  %3573 = vmatprep.mubr.msk.f32.mxu0 %vm3911_vm1, %v3910_v10 }
 0x37d   : > { %v4134_v15 = vmul.f32 %v3795_v13, %v3787_v59  ;;  %3581 = vmatprep.subr.mxu0 %v3910_v10  ;;  %v1237_v21 = vpop.permute.xlu0 %1236  ;;  %v1313_v26 = vpop.permute.xlu1 %1312 }
 0x37f   : > { %3569 = vmatmul.mubr.msk.f32.vlgmr.msra.gmra.mrb[6].mxu1 %vm416_vm2, %v4134_v15 }
 0x380   : > { %v3797_v20 = vpop.eup %3796  ;;  %3577 = vmatpush3.xpose.msk.msra.mxu1 %vm416_vm2, %v1081_v2  ;;  %3578 = vmatprep.mubr.msk.f32.mxu1 %vm3911_vm1, %v3910_v10 }
 0x381   : > { %v4142_v22 = vmul.f32 %v3797_v20, %v3789_v61  ;;  %3586 = vmatprep.subr.mxu1 %v3910_v10  ;;  %v1235_v25 = vpop.permute.xlu0 %1234 }
 0x383   : > { %3574 = vmatmul.mubr.msk.f32.vlgmr.msra.gmra.mrb[10].mxu0 %vm416_vm2, %v4142_v22  ;;  %3579 = vmatmul.mubr.msk.f32.vlgmr.msra.gmra.mrb[8].mxu1 %vm416_vm2, %v1079_v12 }
 0x384   : > { %3582 = vmatpush3.xpose.msk.msra.mxu0 %vm416_vm2, %v1159_v1  ;;  %3587 = vmatpush3.xpose.msk.msra.mxu1 %vm416_vm2, %v1237_v21 }
 0x385   : > { %3583 = vmatprep.mubr.msk.f32.mxu0 %vm3911_vm1, %v3910_v10  ;;  %3588 = vmatprep.mubr.msk.f32.mxu1 %vm3911_vm1, %v3910_v10 }
 0x386   : > { %3591 = vmatprep.subr.mxu0 %v3910_v10  ;;  %3596 = vmatprep.subr.mxu1 %v3910_v10 }
 0x387   : > { %3584 = vmatmul.mubr.msk.f32.vlgmr.msra.gmra.mrb[12].mxu0 %vm416_vm2, %v1157_v16  ;;  %3589 = vmatmul.mubr.msk.f32.vlgmr.msra.gmra.mrb[10].mxu1 %vm416_vm2, %v1235_v25 }
 0x388   : > { %3592 = vmatpush3.xpose.msk.msra.mxu0 %vm416_vm2, %v1315_v23  ;;  %3593 = vmatprep.mubr.msk.f32.mxu0 %vm3911_vm1, %v3910_v10 }
 0x389   : > { %3601 = vmatprep.subr.mxu0 %v3910_v10  ;;  %3598 = vmatprep.mubr.msk.f32.mxu1 %vm3911_vm1, %v3910_v10 }
 0x38b   : > { %3594 = vmatmul.mubr.msk.f32.vlgmr.msra.gmra.mrb[14].mxu0 %vm416_vm2, %v1313_v26 }
 0x38c   : > { %3603 = vmatprep.mubr.msk.f32.mxu0 %vm3911_vm1, %v3910_v10 }
 0x44a   : > { %v4167_v27 = vpop.f32.mrb[4].mxu1 }
 0x44b   : > { %v3560_v28 = vpop.f32.mrb[5].mxu1 }
 0x44e   : > { %v4169_v29 = vpop.f32.mrb[8].mxu0 }
 0x44f   : > { %v3565_v30 = vpop.f32.mrb[9].mxu0 }
 0x452   : > { %v4171_v31 = vpop.f32.mrb[6].mxu1 }
 0x453   : > { %v3570_v32 = vpop.f32.mrb[7].mxu1 }
 0x456   : > { %v4173_v33 = vpop.f32.mrb[10].mxu0  ;;  %v1152_v34 = vpop.f32.mrb[8].mxu1 }
 0x457   : > { %v1153_v35 = vadd.f32 %v1152_v34, %v4089_v24  ;;  %v3575_v36 = vpop.f32.mrb[11].mxu0  ;;  %v3580_v37 = vpop.f32.mrb[9].mxu1 }
 0x459   : > { %v1390_v38 = vsel %vm416_vm2, %v1153_v35, -inf }
 0x45a   : > { %v1230_v39 = vpop.f32.mrb[12].mxu0  ;;  %1391 = vmax.xlane.f32.xlu0 %v1390_v38  ;;  %v1308_v40 = vpop.f32.mrb[10].mxu1 }
 0x45b   : > { %v1231_v41 = vadd.f32 %v1230_v39, %v4089_v24  ;;  %v1309_v42 = vadd.f32 %v1308_v40, %v4089_v24  ;;  %v3585_v43 = vpop.f32.mrb[13].mxu0  ;;  %v3590_v44 = vpop.f32.mrb[11].mxu1 }
 0x45d   : > { %v1393_v45 = vsel %vm416_vm2, %v1231_v41, -inf  ;;  %v1396_v46 = vsel %vm416_vm2, %v1309_v42, -inf }
 0x45e   : > { %1394 = vmax.xlane.f32.xlu1 %v1393_v45  ;;  %v1386_v47 = vpop.f32.mrb[14].mxu0  ;;  %1397 = vmax.xlane.f32.xlu0 %v1396_v46 }
 0x45f   : > { %v1387_v48 = vadd.f32 %v1386_v47, %v4089_v24  ;;  %v3595_v49 = vpop.f32.mrb[15].mxu0 }
 0x461   : > { %v1399_v50 = vsel %vm416_vm2, %v1387_v48, -inf }
 0x462   : > { %1400 = vmax.xlane.f32.xlu0 %v1399_v50 }
 0x46f   : > { %1442 = vrot.lane.b32.xlu1 %v4050_v14, %s3916_s21 }
 0x473   : > { %1594 = vrot.lane.b32.xlu1 %v4055_v18, %s3916_s21 }
 0x477   : > { %1670 = vrot.lane.b32.xlu1 %v4057_v19, %s3916_s21 }
 0x478   : > { %1518 = vrot.lane.b32.xlu0 %v4053_v17, %s3916_s21  ;;  %s3441_s21 = sshll.u32 %s3989_s28, 9  ;;  %s3926_s28 = smov [#allocation2]  }
 0x47b   : > { %1826 = vrot.lane.b32.xlu1 %v4053_v17, %s3917_s23 }
 0x47c   : > { %1748 = vrot.lane.b32.xlu0 %v4050_v14, %s3917_s23 }
 0x4e7   : > { %v1392_v51 = vpop.xlane.xlu0 %1391 }
 0x4e8   : > { %v1402_v52 = vsub.f32 %v1153_v35, %v1392_v51 }
 0x4ea   : > { %v1406_v53 = vmul.f32 1.442695, %v1402_v52 }
 0x4eb   : > { %v1395_v54 = vpop.xlane.xlu1 %1394  ;;  %v1398_v55 = vpop.xlane.xlu0 %1397 }
 0x4ec   : > { %3798 = vpow2.f32 %v1406_v53  ;;  %v1403_v56 = vsub.f32 %v1231_v41, %v1395_v54  ;;  %v1404_v5 = vsub.f32 %v1309_v42, %v1398_v55 }
 0x4ee   : > { %v1408_v57 = vmul.f32 1.442695, %v1403_v56  ;;  %v1410_v6 = vmul.f32 1.442695, %v1404_v5 }
 0x4ef   : > { %v1443_v58 = vpop.permute.xlu1 %1442  ;;  %v1401_v59 = vpop.xlane.xlu0 %1400 }
 0x4f0   : > { %3800 = vpow2.f32 %v1408_v57  ;;  %v1405_v60 = vsub.f32 %v1387_v48, %v1401_v59  ;;  %3597 = vmatpush3.msra.mxu1 %v1443_v58 }
 0x4f1   : > { %3606 = vmatprep.subr.mxu1 %v3910_v10 }
 0x4f2   : > { %v1412_v61 = vmul.f32 1.442695, %v1405_v60 }
 0x4f3   : > { %v1519_v62 = vpop.permute.xlu0 %1518  ;;  %v1595_v12 = vpop.permute.xlu1 %1594 }
 0x4f4   : > { %3802 = vpow2.f32 %v1412_v61  ;;  %3602 = vmatpush3.msra.mxu0 %v1519_v62 }
 0x4f5   : > { %3611 = vmatprep.subr.mxu0 %v3910_v10  ;;  %3804 = vpow2.f32 %v1410_v6 }
 0x4f6   : > { %v3799_v63 = vpop.eup %3798 }
 0x4f7   : > { %v1414_v0 = vsel %vm416_vm2, %v3799_v63, 0.0  ;;  %v1671_v13 = vpop.permute.xlu1 %1670  ;;  %v1749_v20 = vpop.permute.xlu0 %1748 }
 0x4f8   : > { %1415 = vadd.xlane.f32.xlu1 %v1414_v0 }
 0x4fa   : > { %v3801_v1 = vpop.eup %3800 }
 0x4fb   : > { %v1417_v2 = vsel %vm416_vm2, %v3801_v1, 0.0  ;;  %v1827_v16 = vpop.permute.xlu1 %1826 }
 0x4fc   : > { %1418 = vadd.xlane.f32.xlu0 %v1417_v2 }
 0x4fe   : > { %v3803_v3 = vpop.eup %3802 }
 0x4ff   : > { %v1423_v4 = vsel %vm416_vm2, %v3803_v3, 0.0  ;;  %v3805_v8 = vpop.eup %3804 }
 0x500   : > { %1424 = vadd.xlane.f32.xlu0 %v1423_v4  ;;  %v1420_v9 = vsel %vm416_vm2, %v3805_v8, 0.0 }
 0x509   : > { %1824 = vrot.lane.b32.xlu1 %v4053_v17, %s3918_s29 }
 0x516   : > { %1746 = vrot.lane.b32.xlu0 %v4050_v14, %s3918_s29 }
 0x51a   : > { %1904 = vrot.lane.b32.xlu0 %v4055_v18, %s3917_s23 }
 0x51e   : > { %1902 = vrot.lane.b32.xlu0 %v4055_v18, %s3918_s29 }
 0x522   : > { %2186 = vrot.lane.b32.xlu0 %v4053_v17, %s3919_s8 }
 0x52d   : > { %1421 = vadd.xlane.f32.xlu1 %v1420_v9 }
 0x53e   : > { %1982 = vrot.lane.b32.xlu1 %v4057_v19, %s3917_s23 }
 0x542   : > { %1980 = vrot.lane.b32.xlu1 %v4057_v19, %s3918_s29 }
 0x546   : > { %2110 = vrot.lane.b32.xlu1 %v4050_v14, %s3919_s8 }
 0x54a   : > { %2262 = vrot.lane.b32.xlu1 %v4055_v18, %s3919_s8 }
 0x54e   : > { %2338 = vrot.lane.b32.xlu1 %v4057_v19, %s3919_s8  ;;  %s4440_s8 = scalar_lea.hbm %s4508_s7, %s3441_s21 }
 0x585   : > { %v1416_v21 = vpop.xlane.xlu1 %1415 }
 0x586   : > { %3806 = vrcp.f32 %v1416_v21 }
 0x589   : > { %v1419_v23 = vpop.xlane.xlu0 %1418  ;;  %v1825_v36 = vpop.permute.xlu1 %1824 }
 0x58a   : > { %3808 = vrcp.f32 %v1419_v23 }
 0x58d   : > { %v1425_v25 = vpop.xlane.xlu0 %1424 }
 0x58e   : > { %3810 = vrcp.f32 %v1425_v25 }
 0x590   : > { %v3807_v26 = vpop.eup %3806 }
 0x591   : > { %v4209_v28 = vmul.f32 %v3807_v26, %v3799_v63  ;;  %v1747_v37 = vpop.permute.xlu0 %1746 }
 0x593   : > { %3599 = vmatmul.mubr.msk.f32.vlgmr.msra.gmra.mrb[12].mxu1 %vm416_vm2, %v4209_v28 }
 0x594   : > { %v3809_v30 = vpop.eup %3808  ;;  %3607 = vmatpush3.msra.mxu1 %v1595_v12  ;;  %3608 = vmatprep.mubr.msk.f32.mxu1 %vm3911_vm1, %v3910_v10 }
 0x595   : > { %v4215_v32 = vmul.f32 %v3809_v30, %v3801_v1  ;;  %3616 = vmatprep.subr.mxu1 %v3910_v10  ;;  %v1905_v38 = vpop.permute.xlu0 %1904 }
 0x597   : > { %3604 = vmatmul.mubr.msk.f32.vlgmr.msra.gmra.mrb[16].mxu0 %vm416_vm2, %v4215_v32 }
 0x598   : > { %v3811_v34 = vpop.eup %3810  ;;  %3612 = vmatpush3.msra.mxu0 %v1671_v13  ;;  %3613 = vmatprep.mubr.msk.f32.mxu0 %vm3911_vm1, %v3910_v10 }
 0x599   : > { %v4222_v35 = vmul.f32 %v3811_v34, %v3803_v3  ;;  %3621 = vmatprep.subr.mxu0 %v3910_v10  ;;  %v1903_v40 = vpop.permute.xlu0 %1902 }
 0x59b   : > { %3614 = vmatmul.mubr.msk.f32.vlgmr.msra.gmra.mrb[18].mxu0 %vm416_vm2, %v4222_v35 }
 0x59c   : > { %3623 = vmatprep.mubr.msk.f32.mxu0 %vm3911_vm1, %v3910_v10 }
 0x59d   : > { %v2187_v43 = vpop.permute.xlu0 %2186 }
 0x59f   : > { %3622 = vmatpush3.xpose.msk.msra.mxu0 %vm416_vm2, %v1827_v16 }
 0x5a0   : > { %3631 = vmatprep.subr.mxu0 %v3910_v10 }
 0x5a2   : > { %3624 = vmatmul.mubr.msk.f32.vlgmr.msra.gmra.mrb[20].mxu0 %vm416_vm2, %v1825_v36 }
 0x5a3   : > { %3633 = vmatprep.mubr.msk.f32.mxu0 %vm3911_vm1, %v3910_v10 }
 0x5ba   : > { %v1422_v39 = vpop.xlane.xlu1 %1421 }
 0x5bb   : > { %3812 = vrcp.f32 %v1422_v39 }
 0x5be   : > { %v1983_v41 = vpop.permute.xlu1 %1982 }
 0x5bf   : > { %3632 = vmatpush3.xpose.msk.msra.mxu0 %vm416_vm2, %v1983_v41 }
 0x5c0   : > { %3641 = vmatprep.subr.mxu0 %v3910_v10 }
 0x5c2   : > { %v1981_v42 = vpop.permute.xlu1 %1980 }
 0x5c3   : > { %3634 = vmatmul.mubr.msk.f32.vlgmr.msra.gmra.mrb[22].mxu0 %vm416_vm2, %v1981_v42 }
 0x5c4   : > { %3642 = vmatpush3.msra.mxu0 %v2187_v43  ;;  %3643 = vmatprep.mubr.msk.f32.mxu0 %vm3911_vm1, %v3910_v10 }
 0x5c5   : > { %v3813_v44 = vpop.eup %3812  ;;  %3651 = vmatprep.subr.mxu0 %v3910_v10 }
 0x5c6   : > { %v4240_v45 = vmul.f32 %v3813_v44, %v3805_v8  ;;  %v2111_v46 = vpop.permute.xlu1 %2110 }
 0x5c8   : > { %3609 = vmatmul.mubr.msk.f32.vlgmr.msra.gmra.mrb[14].mxu1 %vm416_vm2, %v4240_v45 }
 0x5c9   : > { %3617 = vmatpush3.xpose.msk.msra.mxu1 %vm416_vm2, %v1749_v20  ;;  %3618 = vmatprep.mubr.msk.f32.mxu1 %vm3911_vm1, %v3910_v10 }
 0x5ca   : > { %3626 = vmatprep.subr.mxu1 %v3910_v10  ;;  %v2263_v8 = vpop.permute.xlu1 %2262 }
 0x5cc   : > { %3619 = vmatmul.mubr.msk.f32.vlgmr.msra.gmra.mrb[16].mxu1 %vm416_vm2, %v1747_v37 }
 0x5cd   : > { %3627 = vmatpush3.xpose.msk.msra.mxu1 %vm416_vm2, %v1905_v38  ;;  %3628 = vmatprep.mubr.msk.f32.mxu1 %vm3911_vm1, %v3910_v10 }
 0x5ce   : > { %3636 = vmatprep.subr.mxu1 %v3910_v10  ;;  %v2339_v9 = vpop.permute.xlu1 %2338 }
 0x5d0   : > { %3629 = vmatmul.mubr.msk.f32.vlgmr.msra.gmra.mrb[18].mxu1 %vm416_vm2, %v1903_v40 }
 0x5d1   : > { %3637 = vmatpush3.msra.mxu1 %v2111_v46  ;;  %3638 = vmatprep.mubr.msk.f32.mxu1 %vm3911_vm1, %v3910_v10 }
 0x5d2   : > { %3646 = vmatprep.subr.mxu1 %v3910_v10 }
 0x666   : > { %v4257_v47 = vpop.f32.mrb[12].mxu1 }
 0x667   : > { %v3600_v48 = vpop.f32.mrb[13].mxu1 }
 0x66a   : > { %v4259_v49 = vpop.f32.mrb[16].mxu0 }
 0x66b   : > { %v3605_v50 = vpop.f32.mrb[17].mxu0 }
 0x66e   : > { %v4261_v51 = vpop.f32.mrb[18].mxu0 }
 0x66f   : > { %v3615_v52 = vpop.f32.mrb[19].mxu0 }
 0x675   : > { %v1898_v53 = vpop.f32.mrb[20].mxu0 }
 0x676   : > { %v1899_v54 = vadd.f32 %v1898_v53, %v4089_v24  ;;  %v3625_v55 = vpop.f32.mrb[21].mxu0  ;;  %v1439_v53 = vadd.f32 %v4215_v32, %v4127_v11  ;;  %v1438_v11 = vadd.f32 %v4209_v28, %v4121_v7 }
 0x678   : > { %v2061_v56 = vsel %vm416_vm2, %v1899_v54, -inf }
 0x679   : > { %2062 = vmax.xlane.f32.xlu1 %v2061_v56 }
 0x68a   : > { %2494 = vrot.lane.b32.xlu1 %v4053_v17, %s3920_s9 }
 0x68e   : > { %2492 = vrot.lane.b32.xlu1 %v4053_v17, %s3921_s13 }
 0x696   : > { %v2054_v57 = vpop.f32.mrb[22].mxu0 }
 0x697   : > { %v3635_v58 = vpop.f32.mrb[23].mxu0  ;;  %v2055_v0 = vadd.f32 %v2054_v57, %v4089_v24 }
 0x699   : > { %v2067_v5 = vsel %vm416_vm2, %v2055_v0, -inf }
 0x69b   : > { %v4269_v59 = vpop.f32.mrb[14].mxu1 }
 0x69c   : > { %v3610_v60 = vpop.f32.mrb[15].mxu1 }
 0x69f   : > { %v1820_v61 = vpop.f32.mrb[16].mxu1 }
 0x6a0   : > { %v1821_v62 = vadd.f32 %v1820_v61, %v4089_v24  ;;  %v3620_v63 = vpop.f32.mrb[17].mxu1 }
 0x6a2   : > { %v2058_v1 = vsel %vm416_vm2, %v1821_v62, -inf }
 0x6a3   : > { %2059 = vmax.xlane.f32.xlu0 %v2058_v1  ;;  %v1976_v2 = vpop.f32.mrb[18].mxu1  ;;  %v1441_v1 = vadd.f32 %v4222_v35, %v4142_v22 }
 0x6a4   : > { %v3630_v3 = vpop.f32.mrb[19].mxu1  ;;  %v1977_v4 = vadd.f32 %v1976_v2, %v4089_v24 }
 0x6a6   : > { %v2064_v6 = vsel %vm416_vm2, %v1977_v4, -inf }
 0x6a7   : > { %2068 = vmax.xlane.f32.xlu0 %v2067_v5 }
 0x6ab   : > { %2065 = vmax.xlane.f32.xlu0 %v2064_v6 }
 0x6c1   : > { %2416 = vrot.lane.b32.xlu0 %v4050_v14, %s3920_s9 }
 0x706   : > { %v2063_v12 = vpop.xlane.xlu1 %2062 }
 0x707   : > { %v2071_v13 = vsub.f32 %v1899_v54, %v2063_v12 }
 0x709   : > { %v2076_v16 = vmul.f32 1.442695, %v2071_v13 }
 0x70a   : > { %v2495_v56 = vpop.permute.xlu1 %2494 }
 0x70b   : > { %3814 = vpow2.f32 %v2076_v16 }
 0x70e   : > { %v2493_v57 = vpop.permute.xlu1 %2492 }
 0x715   : > { %v3815_v20 = vpop.eup %3814 }
 0x716   : > { %v2085_v21 = vsel %vm416_vm2, %v3815_v20, 0.0 }
 0x717   : > { %2086 = vadd.xlane.f32.xlu0 %v2085_v21 }
 0x72d   : > { %2414 = vrot.lane.b32.xlu0 %v4050_v14, %s3921_s13 }
 0x730   : > { %v2060_v23 = vpop.xlane.xlu0 %2059 }
 0x731   : > { %v2070_v25 = vsub.f32 %v1821_v62, %v2060_v23 }
 0x733   : > { %v2074_v26 = vmul.f32 1.442695, %v2070_v25 }
 0x734   : > { %v2069_v30 = vpop.xlane.xlu0 %2068 }
 0x735   : > { %3816 = vpow2.f32 %v2074_v26  ;;  %v2073_v34 = vsub.f32 %v2055_v0, %v2069_v30 }
 0x737   : > { %v2080_v36 = vmul.f32 1.442695, %v2073_v34 }
 0x738   : > { %v2066_v41 = vpop.xlane.xlu0 %2065 }
 0x739   : > { %3818 = vpow2.f32 %v2080_v36  ;;  %v2072_v42 = vsub.f32 %v1977_v4, %v2066_v41  ;;  %v1440_v4 = vadd.f32 %v4240_v45, %v4134_v15 }
 0x73b   : > { %v2078_v43 = vmul.f32 1.442695, %v2072_v42 }
 0x73c   : > { %v2417_v48 = vpop.permute.xlu0 %2416 }
 0x73d   : > { %3820 = vpow2.f32 %v2078_v43 }
 0x73f   : > { %v3817_v37 = vpop.eup %3816 }
 0x740   : > { %v2082_v38 = vsel %vm416_vm2, %v3817_v37, 0.0 }
 0x741   : > { %2083 = vadd.xlane.f32.xlu1 %v2082_v38 }
 0x743   : > { %v3819_v39 = vpop.eup %3818 }
 0x744   : > { %v2091_v40 = vsel %vm416_vm2, %v3819_v39, 0.0 }
 0x747   : > { %v3821_v44 = vpop.eup %3820 }
 0x748   : > { %v2088_v46 = vsel %vm416_vm2, %v3821_v44, 0.0 }
 0x74c   : > { %2092 = vadd.xlane.f32.xlu0 %v2091_v40 }
 0x752   : > { %2650 = vrot.lane.b32.xlu1 %v4057_v19, %s3920_s9 }
 0x762   : > { %2572 = vrot.lane.b32.xlu0 %v4055_v18, %s3920_s9  ;;  %s3282_s9 = sshll.u32 %s4382_s20, 4  ;;  %s4443_s9 = int_to_ptr.vmem [resolvable:$true] %s3282_s9 }
 0x766   : > { %2570 = vrot.lane.b32.xlu0 %v4055_v18, %s3921_s13 }
 0x776   : > { %2089 = vadd.xlane.f32.xlu1 %v2088_v46 }
 0x787   : > { %2648 = vrot.lane.b32.xlu1 %v4057_v19, %s3921_s13  ;;  %s4447_s13 = scalar_lea.sflag [#allocation3], %s278_s17 }
 0x7a4   : > { %v2087_v50 = vpop.xlane.xlu0 %2086 }
 0x7a5   : > { %3822 = vrcp.f32 %v2087_v50 }
 0x7a8   : > { %v2415_v60 = vpop.permute.xlu0 %2414 }
 0x7af   : > { %v3823_v52 = vpop.eup %3822 }
 0x7b0   : > { %v2103_v54 = vmul.f32 %v3823_v52, %v3815_v20 }
 0x7b2   : > { %v4295_v55 = vadd.f32 %v2103_v54, %v1439_v53  ;;  %3644 = vmatmul.mubr.msk.f32.vlgmr.msra.gmra.mrb[24].mxu0 %vm416_vm2, %v2103_v54 }
 0x7b3   : > { %3652 = vmatpush3.msra.mxu0 %v2339_v9  ;;  %3653 = vmatprep.mubr.msk.f32.mxu0 %vm3911_vm1, %v3910_v10 }
 0x7b4   : > { %3661 = vmatprep.subr.mxu0 %v3910_v10 }
 0x7ce   : > { %v2084_v58 = vpop.xlane.xlu1 %2083 }
 0x7cf   : > { %3824 = vrcp.f32 %v2084_v58 }
 0x7d2   : > { %v2651_v7 = vpop.permute.xlu1 %2650 }
 0x7d9   : > { %v3825_v61 = vpop.eup %3824  ;;  %v2093_v62 = vpop.xlane.xlu0 %2092 }
 0x7da   : > { %v2102_v32 = vmul.f32 %v3825_v61, %v3817_v37  ;;  %3826 = vrcp.f32 %v2093_v62 }
 0x7dc   : > { %v4303_v63 = vadd.f32 %v2102_v32, %v1438_v11  ;;  %3639 = vmatmul.mubr.msk.f32.vlgmr.msra.gmra.mrb[20].mxu1 %vm416_vm2, %v2102_v32 }
 0x7dd   : > { %3647 = vmatpush3.msra.mxu1 %v2263_v8  ;;  %3648 = vmatprep.mubr.msk.f32.mxu1 %vm3911_vm1, %v3910_v10  ;;  %v2573_v8 = vpop.permute.xlu0 %2572 }
 0x7de   : > { %3656 = vmatprep.subr.mxu1 %v3910_v10 }
 0x7e1   : > { %v2571_v15 = vpop.permute.xlu0 %2570 }
 0x7e4   : > { %v3827_v0 = vpop.eup %3826 }
 0x7e5   : > { %v2105_v2 = vmul.f32 %v3827_v0, %v3819_v39 }
 0x7e7   : > { %v4311_v3 = vadd.f32 %v2105_v2, %v1441_v1  ;;  %3654 = vmatmul.mubr.msk.f32.vlgmr.msra.gmra.mrb[26].mxu0 %vm416_vm2, %v2105_v2 }
 0x7e8   : > { %3662 = vmatpush3.xpose.msk.msra.mxu0 %vm416_vm2, %v2495_v56  ;;  %3663 = vmatprep.mubr.msk.f32.mxu0 %vm3911_vm1, %v3910_v10 }
 0x7e9   : > { %3671 = vmatprep.subr.mxu0 %v3910_v10 }
 0x7eb   : > { %3664 = vmatmul.mubr.msk.f32.vlgmr.msra.gmra.mrb[28].mxu0 %vm416_vm2, %v2493_v57 }
 0x7ec   : > { %3672 = vmatpush3.xpose.msk.msra.mxu0 %vm416_vm2, %v2651_v7  ;;  %3673 = vmatprep.mubr.msk.f32.mxu0 %vm3911_vm1, %v3910_v10 }
 0x7ed   : > { %3681 = vmatprep.subr.mxu0 %v3910_v10 }
 0x803   : > { %v2090_v22 = vpop.xlane.xlu1 %2089 }
 0x804   : > { %3828 = vrcp.f32 %v2090_v22 }
 0x807   : > { %v2649_v28 = vpop.permute.xlu1 %2648 }
 0x808   : > { %3674 = vmatmul.mubr.msk.f32.vlgmr.msra.gmra.mrb[30].mxu0 %vm416_vm2, %v2649_v28 }
 0x809   : > { %3683 = vmatprep.mubr.msk.f32.mxu0 %vm3911_vm1, %v3910_v10 }
 0x80e   : > { %v3829_v35 = vpop.eup %3828 }
 0x80f   : > { %v2104_v5 = vmul.f32 %v3829_v35, %v3821_v44 }
 0x811   : > { %v4328_v6 = vadd.f32 %v2104_v5, %v1440_v4  ;;  %3649 = vmatmul.mubr.msk.f32.vlgmr.msra.gmra.mrb[22].mxu1 %vm416_vm2, %v2104_v5 }
 0x812   : > { %3657 = vmatpush3.xpose.msk.msra.mxu1 %vm416_vm2, %v2417_v48  ;;  %3658 = vmatprep.mubr.msk.f32.mxu1 %vm3911_vm1, %v3910_v10 }
 0x813   : > { %3666 = vmatprep.subr.mxu1 %v3910_v10 }
 0x815   : > { %3659 = vmatmul.mubr.msk.f32.vlgmr.msra.gmra.mrb[24].mxu1 %vm416_vm2, %v2415_v60 }
 0x816   : > { %3667 = vmatpush3.xpose.msk.msra.mxu1 %vm416_vm2, %v2573_v8  ;;  %3668 = vmatprep.mubr.msk.f32.mxu1 %vm3911_vm1, %v3910_v10 }
 0x817   : > { %3676 = vmatprep.subr.mxu1 %v3910_v10 }
 0x819   : > { %3669 = vmatmul.mubr.msk.f32.vlgmr.msra.gmra.mrb[26].mxu1 %vm416_vm2, %v2571_v15 }
 0x81a   : > { %3678 = vmatprep.mubr.msk.f32.mxu1 %vm3911_vm1, %v3910_v10 }
 0x885   : > { %v4343_v45 = vpop.f32.mrb[24].mxu0 }
 0x886   : > { %v3645_v9 = vpop.f32.mrb[25].mxu0 }
 0x8af   : > { %v2182_v12 = vpop.f32.mrb[20].mxu1 }
 0x8b0   : > { %v3640_v13 = vpop.f32.mrb[21].mxu1 }
 0x8ba   : > { %v4345_v16 = vpop.f32.mrb[26].mxu0 }
 0x8bb   : > { %v3655_v20 = vpop.f32.mrb[27].mxu0 }
 0x8be   : > { %v2566_v21 = vpop.f32.mrb[28].mxu0 }
 0x8bf   : > { %v2567_v23 = vadd.f32 %v2566_v21, %v4089_v24  ;;  %v3665_v25 = vpop.f32.mrb[29].mxu0 }
 0x8c1   : > { %v2729_v26 = vsel %vm416_vm2, %v2567_v23, -inf }
 0x8c2   : > { %2730 = vmax.xlane.f32.xlu1 %v2729_v26 }
 0x8d3   : > { %2778 = vrot.lane.b32.xlu1 %v4050_v14, %s3922_s14 }
 0x8db   : > { %v2722_v30 = vpop.f32.mrb[30].mxu0 }
 0x8dc   : > { %v3675_v34 = vpop.f32.mrb[31].mxu0  ;;  %v2723_v46 = vadd.f32 %v2722_v30, %v4089_v24  ;;  %v300_v30 = vld [vmem:[%s4504_s3 + $0x8] sm:$0xff] }
 0x8dd   : > { %v301_v34 = vld [vmem:[%s4504_s3 + $0x10] sm:$0xff] }
 0x8de   : > { %v2735_v14 = vsel %vm416_vm2, %v2723_v46, -inf }
 0x8e4   : > { %v2334_v36 = vpop.f32.mrb[22].mxu1 }
 0x8e5   : > { %v3650_v37 = vpop.f32.mrb[23].mxu1 }
 0x8e8   : > { %v2488_v38 = vpop.f32.mrb[24].mxu1 }
 0x8e9   : > { %v2489_v39 = vadd.f32 %v2488_v38, %v4089_v24  ;;  %v3660_v40 = vpop.f32.mrb[25].mxu1 }
 0x8eb   : > { %v2726_v41 = vsel %vm416_vm2, %v2489_v39, -inf }
 0x8ec   : > { %2727 = vmax.xlane.f32.xlu0 %v2726_v41  ;;  %v2644_v42 = vpop.f32.mrb[26].mxu1 }
 0x8ed   : > { %v2645_v43 = vadd.f32 %v2644_v42, %v4089_v24  ;;  %v3670_v44 = vpop.f32.mrb[27].mxu1 }
 0x8ef   : > { %v2732_v48 = vsel %vm416_vm2, %v2645_v43, -inf }
 0x8f0   : > { %2733 = vmax.xlane.f32.xlu0 %v2732_v48 }
 0x8f4   : > { %2736 = vmax.xlane.f32.xlu0 %v2735_v14 }
 0x94f   : > { %v2731_v50 = vpop.xlane.xlu1 %2730 }
 0x950   : > { %v2739_v52 = vsub.f32 %v2567_v23, %v2731_v50 }
 0x952   : > { %v2744_v53 = vmul.f32 1.442695, %v2739_v52 }
 0x953   : > { %v2779_v54 = vpop.permute.xlu1 %2778 }
 0x954   : > { %3830 = vpow2.f32 %v2744_v53  ;;  %3677 = vmatpush3.msra.mxu1 %v2779_v54 }
 0x955   : > { %3686 = vmatprep.subr.mxu1 %v3910_v10 }
 0x95e   : > { %v3831_v56 = vpop.eup %3830 }
 0x95f   : > { %v2753_v57 = vsel %vm416_vm2, %v3831_v56, 0.0 }
 0x960   : > { %2754 = vadd.xlane.f32.xlu0 %v2753_v57 }
 0x979   : > { %v2728_v58 = vpop.xlane.xlu0 %2727 }
 0x97a   : > { %v2738_v24 = vsub.f32 %v2489_v39, %v2728_v58 }
 0x97c   : > { %v2742_v60 = vmul.f32 1.442695, %v2738_v24 }
 0x97d   : > { %v2734_v61 = vpop.xlane.xlu0 %2733 }
 0x97e   : > { %3832 = vpow2.f32 %v2742_v60  ;;  %v2740_v22 = vsub.f32 %v2645_v43, %v2734_v61 }
 0x980   : > { %v2746_v28 = vmul.f32 1.442695, %v2740_v22 }
 0x981   : > { %v2737_v62 = vpop.xlane.xlu0 %2736 }
 0x982   : > { %v2741_v11 = vsub.f32 %v2723_v46, %v2737_v62 }
 0x984   : > { %v2748_v32 = vmul.f32 1.442695, %v2741_v11 }
 0x986   : > { %3834 = vpow2.f32 %v2748_v32 }
 0x987   : > { %3836 = vpow2.f32 %v2746_v28 }
 0x988   : > { %v3833_v0 = vpop.eup %3832 }
 0x989   : > { %v2750_v1 = vsel %vm416_vm2, %v3833_v0, 0.0 }
 0x98a   : > { %2751 = vadd.xlane.f32.xlu1 %v2750_v1 }
 0x990   : > { %v3835_v2 = vpop.eup %3834 }
 0x991   : > { %v2759_v7 = vsel %vm416_vm2, %v3835_v2, 0.0  ;;  %v3837_v35 = vpop.eup %3836 }
 0x992   : > { %2760 = vadd.xlane.f32.xlu0 %v2759_v7 }
 0x99b   : > { %2930 = vrot.lane.b32.xlu1 %v4055_v18, %s3922_s14  ;;  %v2756_v18 = vsel %vm416_vm2, %v3837_v35, 0.0 }
 0x9a8   : > { %2854 = vrot.lane.b32.xlu0 %v4053_v17, %s3922_s14 }
 0x9ac   : > { %3086 = vrot.lane.b32.xlu0 %v4257_v47, %s3923_s15 }
 0x9b0   : > { %3102 = vrot.lane.b32.xlu0 %v2182_v12, %s3924_s16 }
 0x9b4   : > { %3090 = vrot.lane.b32.xlu0 %v4269_v59, %s3923_s15 }
 0x9b8   : > { %3106 = vrot.lane.b32.xlu0 %v2334_v36, %s3924_s16 }
 0x9bf   : > { %2757 = vadd.xlane.f32.xlu1 %v2756_v18 }
 0x9d0   : > { %3006 = vrot.lane.b32.xlu1 %v4057_v19, %s3922_s14  ;;  %s3846_s14 = scalar_lea.vmem %s4443_s9, 512 }
 0x9d1   : > { %p3847_p11 = scmp.ne.s32.totalorder %s4443_s9, %s3846_s14 }
 0x9d3   : > { %p3848_p12 = pnand %p3847_p11, %p4006_p5 }
 0x9d4   : > { %3088 = vrot.lane.b32.xlu1 %v4259_v49, %s3923_s15 }
 0x9d5   : > { %p3849_p13 = pneg %p3848_p12 }
 0x9d8   : > { %3104 = vrot.lane.b32.xlu1 %v4343_v45, %s3924_s16 }
 0x9dc   : > { %3092 = vrot.lane.b32.xlu1 %v4261_v51, %s3923_s15 }
 0x9e0   : > { %3108 = vrot.lane.b32.xlu1 %v4345_v16, %s3924_s16  ;;  %s3850_s16 = sshll.u32 %s3926_s28, 4  ;;  %s3851_s16 = int_to_ptr.vmem [resolvable:$false] %s3850_s16 }
 0x9e1   : > { %p3853_p0 = scmp.lt.s32.totalorder %s4443_s9, %s3851_s16 }
 0x9ed   : > { %v2755_v17 = vpop.xlane.xlu0 %2754 }
 0x9ee   : > { %3838 = vrcp.f32 %v2755_v17 }
 0x9f8   : > { %v3839_v47 = vpop.eup %3838 }
 0x9f9   : > { %v2771_v59 = vmul.f32 %v3839_v47, %v3831_v56 }
 0x9fb   : > { %v2775_v4 = vadd.f32 %v2771_v59, %v4295_v55 }
 0x9fd   : > { %v3252_v19 = vmul.f32 0.25, %v2775_v4 }
 0x9ff   : > { %3256 = vst.msk [vmem:[%s4382_s20 + $0x8] sm:$0xff] %vm416_vm2, %v3252_v19 }
 0xa17   : > { %v2752_v49 = vpop.xlane.xlu1 %2751 }
 0xa18   : > { %3840 = vrcp.f32 %v2752_v49 }
 0xa1b   : > { %v2931_v9 = vpop.permute.xlu1 %2930 }
 0xa1f   : > { %v2761_v51 = vpop.xlane.xlu0 %2760 }
 0xa20   : > { %3842 = vrcp.f32 %v2761_v51 }
 0xa22   : > { %v3841_v5 = vpop.eup %3840 }
 0xa23   : > { %v2770_v8 = vmul.f32 %v3841_v5, %v3833_v0  ;;  %v2855_v15 = vpop.permute.xlu0 %2854 }
 0xa24   : > { %3682 = vmatpush3.msra.mxu0 %v2855_v15 }
 0xa25   : > { %v2774_v45 = vadd.f32 %v2770_v8, %v4303_v63  ;;  %3679 = vmatmul.mubr.msk.f32.vlgmr.msra.gmra.mrb[28].mxu1 %vm416_vm2, %v2770_v8  ;;  %3684 = vmatmul.mubr.msk.f32.vlgmr.msra.gmra.mrb[32].mxu0 %vm416_vm2, %v2771_v59 }
 0xa26   : > { %3687 = vmatpush3.msra.mxu1 %v2931_v9  ;;  %3691 = vmatprep.subr.mxu0 %v3910_v10 }
 0xa27   : > { %v3251_v55 = vmul.f32 0.25, %v2774_v45  ;;  %3693 = vmatprep.mubr.msk.f32.mxu0 %vm3911_vm1, %v3910_v10  ;;  %3688 = vmatprep.mubr.msk.f32.mxu1 %vm3911_vm1, %v3910_v10  ;;  %v3087_v48 = vpop.permute.xlu0 %3086 }
 0xa28   : > { %v3130_v58 = vsel %vm416_vm2, %v4167_v27, %v3087_v48 }
 0xa29   : > { %3255 = vst.msk [vmem:[%s4382_s20] sm:$0xff] %vm416_vm2, %v3251_v55 }
 0xa2a   : > { %v3843_v12 = vpop.eup %3842 }
 0xa2b   : > { %v2773_v63 = vmul.f32 %v3843_v12, %v3835_v2  ;;  %v3103_v50 = vpop.permute.xlu0 %3102 }
 0xa2c   : > { %v3135_v60 = vsel %vm3134_vm3, %v3130_v58, %v3103_v50 }
 0xa2d   : > { %v2777_v13 = vadd.f32 %v2773_v63, %v4311_v3  ;;  %v299_v3 = vld [vmem:[%s4504_s3] sm:$0xff] }
 0xa2e   : > { %v3718_v36 = vpack.c.bf16 %v300_v30, %v299_v3 }
 0xa2f   : > { %v3254_v16 = vmul.f32 0.25, %v2777_v13  ;;  %v3091_v53 = vpop.permute.xlu0 %3090 }
 0xa30   : > { %3719 = vmatprep.subr.bf16.mxu1 %v3718_v36  ;;  %v3132_v27 = vsel %vm416_vm2, %v4171_v31, %v3091_v53 }
 0xa31   : > { %3258 = vst.msk [vmem:[%s4382_s20 + $0x18] sm:$0xff] %vm416_vm2, %v3254_v16 }
 0xa33   : > { %v3107_v56 = vpop.permute.xlu0 %3106 }
 0xa34   : > { %v3137_v1 = vsel %vm3134_vm3, %v3132_v27, %v3107_v56 }
 0xa4c   : > { %v2758_v20 = vpop.xlane.xlu1 %2757 }
 0xa4d   : > { %3844 = vrcp.f32 %v2758_v20 }
 0xa50   : > { %v3007_v21 = vpop.permute.xlu1 %3006 }
 0xa51   : > { %3692 = vmatpush3.msra.mxu0 %v3007_v21 }
 0xa52   : > { %3694 = vmatmul.mubr.msk.f32.vlgmr.msra.gmra.mrb[34].mxu0 %vm416_vm2, %v2773_v63 }
 0xa54   : > { %v3089_v14 = vpop.permute.xlu1 %3088 }
 0xa55   : > { %v3131_v24 = vsel %vm416_vm2, %v4169_v29, %v3089_v14 }
 0xa57   : > { %v3845_v23 = vpop.eup %3844 }
 0xa58   : > { %v2772_v25 = vmul.f32 %v3845_v23, %v3837_v35  ;;  %v3105_v52 = vpop.permute.xlu1 %3104 }
 0xa59   : > { %v3136_v61 = vsel %vm3134_vm3, %v3131_v24, %v3105_v52 }
 0xa5a   : > { %v2776_v10 = vadd.f32 %v2772_v25, %v4328_v6  ;;  %3689 = vmatmul.mubr.msk.f32.vlgmr.msra.gmra.mrb[30].mxu1 %vm416_vm2, %v2772_v25  ;;  %v302_v6 = vld [vmem:[%s4504_s3 + $0x18] sm:$0xff] }
 0xa5b   : > { %v3722_v37 = vpack.c.bf16 %v302_v6, %v301_v34  ;;  %3721 = vmatpush3.bf16.msra.mxu1 %v3718_v36 }
 0xa5c   : > { %v3253_v26 = vmul.f32 0.25, %v2776_v10  ;;  %v3093_v54 = vpop.permute.xlu1 %3092 }
 0xa5d   : > { %3723 = vmatprep.subr.bf16.mxu1 %v3722_v37  ;;  %v3133_v2 = vsel %vm416_vm2, %v4173_v33, %v3093_v54 }
 0xa5e   : > { %3257 = vst.msk [vmem:[%s4382_s20 + $0x10] sm:$0xff] %vm416_vm2, %v3253_v26 }
 0xa5f   : > { %3725 = vmatpush3.bf16.msra.mxu1 %v3722_v37 }
 0xa60   : > { %v3109_v57 = vpop.permute.xlu1 %3108 }
 0xa61   : > { %v3138_v22 = vsel %vm3134_vm3, %v3133_v2, %v3109_v57 }
 0xaf8   : > { %v2850_v38 = vpop.f32.mrb[28].mxu1  ;;  %v2926_v39 = vpop.f32.mrb[32].mxu0 }
 0xaf9   : > { %v3680_v40 = vpop.f32.mrb[29].mxu1  ;;  %3118 = vrot.lane.b32.xlu0 %v2850_v38, %s3925_s18  ;;  %3120 = vrot.lane.b32.xlu1 %v2926_v39, %s3925_s18  ;;  %v3685_v41 = vpop.f32.mrb[33].mxu0 }
 0xb25   : > { %v3078_v42 = vpop.f32.mrb[34].mxu0 }
 0xb26   : > { %3124 = vrot.lane.b32.xlu1 %v3078_v42, %s3925_s18  ;;  %v3695_v43 = vpop.f32.mrb[35].mxu0 }
 0xb2d   : > { %v3002_v44 = vpop.f32.mrb[30].mxu1 }
 0xb2e   : > { %v3690_v46 = vpop.f32.mrb[31].mxu1  ;;  %3122 = vrot.lane.b32.xlu0 %v3002_v44, %s3925_s18  ;;  %s3852_s18 = scalar_lea.vmem %s3851_s16, 1024 }
 0xb2f   : > { %p3854_p1 = scmp.lt.s32.totalorder %s3852_s18, %s3846_s14 }
 0xb31   : > { %p3855_p2 = por %p3854_p1, %p3853_p0 }
 0xb33   : > { %p3856_p3 = pnand %p3855_p2, %p3849_p13 }
 0xb6b   : > { %v3121_v62 = vpop.permute.xlu1 %3120  ;;  %v3119_v11 = vpop.permute.xlu0 %3118 }
 0xb6c   : > { %v3141_v32 = vsel %vm3139_vm4, %v3136_v61, %v3121_v62  ;;  %v3140_v0 = vsel %vm3139_vm4, %v3135_v60, %v3119_v11 }
 0xb6d   : > { %3704 = vmatprep.mubr.msk.f32.mxu1 %vm315_vm0, %v3140_v0 }
 0xb6e   : > { %3705 = vmatmul.mubr.msk.f32.vlgmr.msra.gmra.mrb[32].mxu1 %vm315_vm0, %v3141_v32 }
 0xb98   : > { %v3125_v29 = vpop.permute.xlu1 %3124 }
 0xb99   : > { %v3143_v35 = vsel %vm3139_vm4, %v3138_v22, %v3125_v29 }
 0xba0   : > { %v3123_v7 = vpop.permute.xlu0 %3122 }
 0xba1   : > { %v3142_v28 = vsel %vm3139_vm4, %v3137_v1, %v3123_v7 }
 0xba2   : > { %3707 = vmatprep.mubr.msk.f32.mxu1 %vm315_vm0, %v3142_v28 }
 0xba3   : > { %3708 = vmatmul.mubr.msk.f32.gmra.mrb[34].mxu1 %vm315_vm0, %v3143_v35 }
 0xba4   : > { %3859 = shalt.err (!%p3856_p3)
}
 0xba5   : > { %s3860_s17 = scalar_lea.hbm %s4440_s8, 512  ;;  %s3864_s23 = scalar_lea.hbm %s4508_s7, 1024 }
 0xba6   : > { %p3861_p4 = scmp.ne.s32.totalorder %s4440_s8, %s3860_s17  ;;  %p3865_p9 = scmp.lt.u32.totalorder %s4440_s8, %s4508_s7 }
 0xba7   : > { %p3866_p10 = scmp.lt.u32.totalorder %s3864_s23, %s3860_s17  ;;  %p3868_p12 = scmp.lt.u32.totalorder %s3860_s17, %s4440_s8 }
 0xba8   : > { %p3862_p7 = pnand %p3861_p4, %p4006_p5 }
 0xba9   : > { %p3867_p11 = por %p3866_p10, %p3865_p9 }
 0xbaa   : > { %p3863_p8 = pneg %p3862_p7 }
 0xbab   : > { %p3869_p13 = por %p3868_p12, %p3867_p11 }
 0xbad   : > { %p3870_p0 = pnand %p3869_p13, %p3863_p8 }
 0xbaf   : > { %3873 = shalt.err (!%p3870_p0)
}
 0xbb0   : > { %s3927_s14 = smov 128   ;;  %v3431_v31 = vld [vmem:[%s4505_s4] ss:$0 sm:$0xff]  ;;  %s291_s21 = scalar_lea.vmem %s4507_s6, %s3375_s22 }
 0xbb1   : > { %3726 = dma.vmem_to_hbm [thread:$0]  (%p4006_p5), %s4443_s9, 512, %s4440_s8, %s4447_s13, %s3927_s14, %s3927_s14, %s3923_s15  }
 0xc41   : > { %v3706_v33 = vpop.f32.mrb[32].mxu1 }
 0xc42   : > { %v3228_v18 = vpop.f32.mrb[33].mxu1  ;;  %v3234_v47 = vadd.f32 %v3706_v33, %v3431_v31 }
 0xc43   : > { %v3229_v17 = vadd.f32 %v3431_v31, %v3228_v18 }
 0xc44   : > { %3248 = vst.msk [vmem:[%s291_s21 + $0x8] sm:$0xff] %vm315_vm0, %v3234_v47 }
 0xc45   : > { %3247 = vst.msk [vmem:[%s291_s21] sm:$0xff] %vm315_vm0, %v3229_v17 }
 0xc76   : > { %v3709_v59 = vpop.f32.mrb[34].mxu1 }
 0xc77   : > { %v3238_v4 = vpop.f32.mrb[35].mxu1  ;;  %v3244_v49 = vadd.f32 %v3709_v59, %v3431_v31 }
 0xc78   : > { %v3239_v19 = vadd.f32 %v3431_v31, %v3238_v4 }
 0xc79   : > { %3250 = vst.msk [vmem:[%s291_s21 + $0x18] sm:$0xff] %vm315_vm0, %v3244_v49 }
 0xc7a   : > { %3249 = vst.msk [vmem:[%s291_s21 + $0x10] sm:$0xff] %vm315_vm0, %v3239_v19 }
 0xc7b PF: > { %p3732_p5 = scmp.ge.s32.totalorder %s3908_s27, 2  ;;  %s3305_s11 = sand.u32 1, %s3896_s24  }
 0xc7c   : > { %s3306_s19 = scalar_lea.sflag [#allocation3], %s3305_s11 }
 0xc7d   : > { %p3729_p1 = pnand %p3732_p5, %p4010_p6 }
 0xc7f   : > { %3891 = dma.done.wait (!%p3729_p1), %s3306_s19, 512  }
 0xc80   : > { %3893 = vsyncadd (!%p3729_p1), %s3306_s19, 4294966784  ;;  %p18_p2 = scmp.ge.s32.totalorder %s3993_s30, 4   ;;  %s4511_s24 = smov %s3900_s25 }
 0xc81   : > { %s4512_s25 = smov %s3904_s26  ;;  %s4513_s26 = smov %s4004_s10 }
 0xc82   : > { %s4514_s27 = smov %s3993_s30  ;;  %20 = sbr.rel (!%p18_p2) target bundleno = 3 (0x3), region = 91 }
 0xc89   :  { %3311 = vsyncpa [#allocation3], 1 }
 0xc8a   :  { %3313 = vsyncpa [#allocation3 + $0x1], 1 }

</bundles_post_ra>
